<compile_context>
chip_gen: v7x
topology: tpu7x:2x2x1
jax: 0.10.0
libtpu: 0.0.40
codegen_flags: <defaults>
</compile_context>

<pallas_src>
import jax
import jax.numpy as jnp
from jax import lax
from jax.experimental import pallas as pl
from jax.experimental.pallas import tpu as pltpu


# ----------------------------------------------------------------------------
# Pallas kernels
# ----------------------------------------------------------------------------
def _conv_relu_pool_kernel(cols_ref, w_ref, b_ref, o_ref):
    """Fused conv-as-matmul + bias + ReLU + 2x2 max-pool (layer 1).

    cols_ref: (4, K, M)  four pool-corner im2col matrices, K = Cin*KH*KW,
                         M = B*Hp*Wp (lane-dense pooled output positions)
    w_ref:    (Cout, K)  conv weight, PyTorch (Cout, Cin, KH, KW) flattened
    b_ref:    (Cout, 1)  bias column
    o_ref:    (Cout, M)  pooled activation (channel-major, lane-dense layout)
    """
    w = w_ref[...]
    acc = jnp.dot(w, cols_ref[0], preferred_element_type=jnp.float32)
    for q in range(1, 4):
        acc = jnp.maximum(
            acc, jnp.dot(w, cols_ref[q], preferred_element_type=jnp.float32))
    # max(conv_q) + b == max(conv_q + b); relu(max(.)) == max(relu(.)).
    o_ref[...] = jnp.maximum(acc + b_ref[...], 0.0).astype(o_ref.dtype)


def _conv2_pool_fc_kernel(colsT_ref, w2c_ref, b2c_ref,
                          w1_ref, b1_ref, w2f_ref, b2f_ref, w3_ref, b3_ref,
                          o_ref):
    """conv2 + bias + ReLU + 2x2 max-pool fused with fc1+ReLU -> fc2+ReLU -> linear.

    colsT_ref: (4, S*B, K2)  transposed pool-corner im2col, S = Hp2*Wp2 = 25,
                             rows ordered (spatial s, batch b), K2 = 6*5*5
    w2c_ref:   (K2, C2)      conv2 weight transposed, C2 = 16
    b2c_ref:   (1, C2)       conv2 bias row
    w1_ref:    (S, C2, N1)   fc1 weight, pre-permuted so chunk s matches the
                             PyTorch (C,H,W) per-batch flatten order
    b1_ref:    (1, N1)       fc1 bias
    w2f_ref:   (N1, N2), b2f_ref: (1, N2)   fc2
    w3_ref:    (N2, NC), b3_ref: (1, NC)    final linear
    o_ref:     (B, NC)       logits
    """
    w2c = w2c_ref[...]
    a = jnp.dot(colsT_ref[0], w2c, preferred_element_type=jnp.float32)
    for q in range(1, 4):
        a = jnp.maximum(
            a, jnp.dot(colsT_ref[q], w2c, preferred_element_type=jnp.float32))
    p2t = jnp.maximum(a + b2c_ref[...], 0.0)          # (S*B, C2) pooled conv2

    S = w1_ref.shape[0]
    N1 = w1_ref.shape[2]
    B = o_ref.shape[0]

    # fc1 as a sum of S small matmuls over static sublane chunks of p2t.
    h1 = jnp.zeros((B, N1), jnp.float32)
    for s in range(S):
        h1 = h1 + jnp.dot(p2t[s * B:(s + 1) * B, :], w1_ref[s],
                          preferred_element_type=jnp.float32)
    h1 = jnp.maximum(h1 + b1_ref[...], 0.0)           # (B, 120)

    h2 = jnp.dot(h1, w2f_ref[...], preferred_element_type=jnp.float32)
    h2 = jnp.maximum(h2 + b2f_ref[...], 0.0)          # (B, 84)

    out = jnp.dot(h2, w3_ref[...], preferred_element_type=jnp.float32)
    o_ref[...] = (out + b3_ref[...]).astype(o_ref.dtype)


_VMEM_SPEC = pl.BlockSpec(memory_space=pltpu.VMEM)


# ----------------------------------------------------------------------------
# Plain-JAX layout glue (pool-corner im2col)
# ----------------------------------------------------------------------------
def _corner_im2col(xf, KH, KW):
    """Pool-corner im2col in (K, M) layout for conv1.

    xf: (Cin, B, H, W) -> (4, Cin*KH*KW, B*Hp*Wp), Hp = (H-KH+1)//2.
    Corner q = 2*di + dj holds patches for conv output positions
    (2*i + di, 2*j + dj).  K-axis row order matches PyTorch weight flatten.
    """
    Cin, B, H, W = xf.shape
    Hp, Wp = (H - KH + 1) // 2, (W - KW + 1) // 2
    corners = []
    for di in (0, 1):
        for dj in (0, 1):
            taps = []
            for kh in range(KH):
                for kw in range(KW):
                    sl = xf[:, :, di + kh::2, dj + kw::2][:, :, :Hp, :Wp]
                    taps.append(sl.reshape(Cin, B * Hp * Wp))
            t = jnp.stack(taps, axis=0)              # (KH*KW, Cin, M)
            t = jnp.transpose(t, (1, 0, 2))          # (Cin, KH*KW, M)
            corners.append(t.reshape(Cin * KH * KW, B * Hp * Wp))
    return jnp.stack(corners, axis=0)                # (4, K, M)


def _corner_im2col_T(xf, KH, KW):
    """Transposed pool-corner im2col in (M, K) layout for the fused conv2 kernel.

    xf: (Cin, B, H, W) -> (4, Hp*Wp*B, Cin*KH*KW).
    Rows ordered (i, j, b) so row m = (i*Wp + j)*B + b; columns ordered
    (cin, kh, kw) to match the PyTorch conv2 weight flatten.
    """
    Cin, B, H, W = xf.shape
    Hp, Wp = (H - KH + 1) // 2, (W - KW + 1) // 2
    corners = []
    for di in (0, 1):
        for dj in (0, 1):
            taps = []
            for kh in range(KH):
                for kw in range(KW):
                    sl = xf[:, :, di + kh::2, dj + kw::2][:, :, :Hp, :Wp]
                    taps.append(sl)                   # (Cin, B, Hp, Wp)
            t = jnp.stack(taps, axis=0)               # (KH*KW, Cin, B, Hp, Wp)
            t = jnp.transpose(t, (3, 4, 2, 1, 0))     # (Hp, Wp, B, Cin, KH*KW)
            corners.append(t.reshape(Hp * Wp * B, Cin * KH * KW))
    return jnp.stack(corners, axis=0)                 # (4, M, K)


# ----------------------------------------------------------------------------
# Kernel wrappers
# ----------------------------------------------------------------------------
def conv_relu_pool(xf, w_mat, b_col, KH=5, KW=5):
    """Fused valid conv(KHxKW, stride 1) + bias + ReLU + 2x2/2 max-pool.

    xf: (Cin, B, H, W), w_mat: (Cout, Cin*KH*KW), b_col: (Cout, 1)
    Returns pooled feature map (Cout, B, Hp, Wp).
    """
    Cin, B, H, W = xf.shape
    Cout, K = w_mat.shape
    assert K == Cin * KH * KW
    Hp, Wp = (H - KH + 1) // 2, (W - KW + 1) // 2
    cols = _corner_im2col(xf, KH, KW)                 # (4, K, B*Hp*Wp)
    out = pl.pallas_call(
        _conv_relu_pool_kernel,
        out_shape=jax.ShapeDtypeStruct((Cout, B * Hp * Wp), jnp.float32),
        in_specs=[_VMEM_SPEC] * 3,
        out_specs=_VMEM_SPEC,
    )(cols, w_mat, b_col)
    return out.reshape(Cout, B, Hp, Wp)


def conv2_pool_fc(cols2T, w2T, b2row, w1k, b1, w2f, b2f, w3, b3, batch):
    """conv2+ReLU+pool fused with the three FC layers; returns (B, num_classes)."""
    nc = w3.shape[1]
    return pl.pallas_call(
        _conv2_pool_fc_kernel,
        out_shape=jax.ShapeDtypeStruct((batch, nc), jnp.float32),
        in_specs=[_VMEM_SPEC] * 9,
        out_specs=_VMEM_SPEC,
    )(cols2T, w2T, b2row, w1k, b1, w2f, b2f, w3, b3)


# ----------------------------------------------------------------------------
# LeNet parameters (PyTorch layout) + one-time kernel-layout prep + forward
# ----------------------------------------------------------------------------
def init_lenet_params(key, num_classes=10):
    ks = jax.random.split(key, 10)
    s = 0.1
    return {
        "conv1_w": jax.random.normal(ks[0], (6, 1, 5, 5), jnp.float32) * s,
        "conv1_b": jax.random.normal(ks[1], (6,), jnp.float32) * s,
        "conv2_w": jax.random.normal(ks[2], (16, 6, 5, 5), jnp.float32) * s,
        "conv2_b": jax.random.normal(ks[3], (16,), jnp.float32) * s,
        "fc1_w": jax.random.normal(ks[4], (120, 16 * 5 * 5), jnp.float32) * s,
        "fc1_b": jax.random.normal(ks[5], (120,), jnp.float32) * s,
        "fc2_w": jax.random.normal(ks[6], (84, 120), jnp.float32) * s,
        "fc2_b": jax.random.normal(ks[7], (84,), jnp.float32) * s,
        "lin_w": jax.random.normal(ks[8], (num_classes, 84), jnp.float32) * s,
        "lin_b": jax.random.normal(ks[9], (num_classes,), jnp.float32) * s,
    }


def prepare_lenet_params(params):
    """One-time reshape/transpose/permutation of PyTorch params into kernel layout.

    The fc1 weight is permuted so that the fused conv2 kernel can contract the
    pooled conv2 activations chunk-by-chunk (per spatial position s) without
    materializing the PyTorch per-batch (C,H,W) flatten.
    """
    f32 = jnp.float32
    fc1_w = params["fc1_w"].astype(f32)                         # (120, 400), f = c*25+s
    fc1_w_k = jnp.transpose(fc1_w.reshape(120, 16, 25), (2, 1, 0))  # (25, 16, 120)
    return {
        "c1_w": params["conv1_w"].reshape(6, -1).astype(f32),   # (6, 25)
        "c1_b": params["conv1_b"].reshape(-1, 1).astype(f32),   # (6, 1)
        "c2_wT": params["conv2_w"].reshape(16, -1).T.astype(f32),   # (150, 16)
        "c2_b": params["conv2_b"].reshape(1, -1).astype(f32),   # (1, 16)
        "fc1_w": fc1_w_k,                                       # (25, 16, 120)
        "fc1_b": params["fc1_b"].reshape(1, -1).astype(f32),    # (1, 120)
        "fc2_w": params["fc2_w"].T.astype(f32),                 # (120, 84)
        "fc2_b": params["fc2_b"].reshape(1, -1).astype(f32),    # (1, 84)
        "lin_w": params["lin_w"].T.astype(f32),                 # (84, nc)
        "lin_b": params["lin_b"].reshape(1, -1).astype(f32),    # (1, nc)
    }


@jax.jit
def lenet_forward(prep, x):
    """x: (B, 1, 32, 32) NCHW float32 -> logits (B, num_classes)."""
    B = x.shape[0]
    xf = jnp.transpose(x.astype(jnp.float32), (1, 0, 2, 3))     # (1, B, 32, 32)
    p1 = conv_relu_pool(xf, prep["c1_w"], prep["c1_b"])         # (6, B, 14, 14)
    cols2T = _corner_im2col_T(p1, 5, 5)                         # (4, 25*B, 150)
    return conv2_pool_fc(cols2T, prep["c2_wT"], prep["c2_b"],
                         prep["fc1_w"], prep["fc1_b"],
                         prep["fc2_w"], prep["fc2_b"],
                         prep["lin_w"], prep["lin_b"], B)       # (B, num_classes)


# ----------------------------------------------------------------------------
# Pure-JAX reference (in-script numerical sanity check)
# ----------------------------------------------------------------------------
def lenet_reference(params, x):
    dn = ("NCHW", "OIHW", "NCHW")
    out = lax.conv_general_dilated(x, params["conv1_w"], (1, 1), "VALID",
                                   dimension_numbers=dn)
    out = jnp.maximum(out + params["conv1_b"][None, :, None, None], 0.0)
    B, C, H, W = out.shape
    out = out.reshape(B, C, H // 2, 2, W // 2, 2).max(axis=(3, 5))
    out = lax.conv_general_dilated(out, params["conv2_w"], (1, 1), "VALID",
                                   dimension_numbers=dn)
    out = jnp.maximum(out + params["conv2_b"][None, :, None, None], 0.0)
    B, C, H, W = out.shape
    out = out.reshape(B, C, H // 2, 2, W // 2, 2).max(axis=(3, 5))
    out = out.reshape(B, -1)
    out = jnp.maximum(out @ params["fc1_w"].T + params["fc1_b"], 0.0)
    out = jnp.maximum(out @ params["fc2_w"].T + params["fc2_b"], 0.0)
    return out @ params["lin_w"].T + params["lin_b"]


if __name__ == "__main__":
    key = jax.random.PRNGKey(0)
    pkey, xkey = jax.random.split(key)
    params = init_lenet_params(pkey, num_classes=10)
    prep = prepare_lenet_params(params)

    # LeNet geometry requires 32x32 spatial input (-> 16*5*5 flatten). batch=2.
    x = jax.random.normal(xkey, (2, 1, 32, 32), jnp.float32)

    logits = lenet_forward(prep, x)
    jax.block_until_ready(logits)
    assert logits.shape == (2, 10) and logits.dtype == jnp.float32

    ref = jax.jit(lenet_reference)(params, x)
    jax.block_until_ready(ref)
    max_err = float(jnp.max(jnp.abs(logits - ref)))
    assert max_err < 5e-2, f"mismatch vs reference: max_err={max_err}"

    print("KERNEL_OK")
</pallas_src>

<mosaic_0001>
module attributes {stable_mosaic.version = 11 : i64} {
  func.func @_conv_relu_pool_kernel(%arg0: memref<4x25x392xf32, #tpu.memory_space<vmem>>, %arg1: memref<6x25xf32, #tpu.memory_space<vmem>>, %arg2: memref<6x1xf32, #tpu.memory_space<vmem>>, %arg3: memref<6x392xf32, #tpu.memory_space<vmem>>) attributes {dimension_semantics = [], scalar_prefetch = 0 : i64, scratch_operands = 0 : i64, tpu.core_type = #tpu.core_type<tc>} {
    %c0 = arith.constant 0 : index
    %c0_0 = arith.constant 0 : index
    %0 = vector.load %arg1[%c0, %c0_0] : memref<6x25xf32, #tpu.memory_space<vmem>>, vector<6x25xf32>
    %c0_1 = arith.constant 0 : index
    %c0_2 = arith.constant 0 : index
    %c0_3 = arith.constant 0 : index
    %1 = vector.load %arg0[%c0_1, %c0_2, %c0_3] : memref<4x25x392xf32, #tpu.memory_space<vmem>>, vector<1x25x392xf32>
    %2 = vector.shape_cast %1 : vector<1x25x392xf32> to vector<25x392xf32>
    %cst = arith.constant dense<0.000000e+00> : vector<6x392xf32>
    %3 = tpu.matmul %0, %2, %cst {dimension_numbers = #tpu.dot_dimension_numbers<[1], [0], [0], [1], [0, 0, 1, 1], [], []>} : vector<6x25xf32>, vector<25x392xf32>, vector<6x392xf32> -> vector<6x392xf32>
    %c1 = arith.constant 1 : index
    %c0_4 = arith.constant 0 : index
    %c0_5 = arith.constant 0 : index
    %4 = vector.load %arg0[%c1, %c0_4, %c0_5] : memref<4x25x392xf32, #tpu.memory_space<vmem>>, vector<1x25x392xf32>
    %5 = vector.shape_cast %4 : vector<1x25x392xf32> to vector<25x392xf32>
    %cst_6 = arith.constant dense<0.000000e+00> : vector<6x392xf32>
    %6 = tpu.matmul %0, %5, %cst_6 {dimension_numbers = #tpu.dot_dimension_numbers<[1], [0], [0], [1], [0, 0, 1, 1], [], []>} : vector<6x25xf32>, vector<25x392xf32>, vector<6x392xf32> -> vector<6x392xf32>
    %7 = arith.maximumf %3, %6 : vector<6x392xf32>
    %c2 = arith.constant 2 : index
    %c0_7 = arith.constant 0 : index
    %c0_8 = arith.constant 0 : index
    %8 = vector.load %arg0[%c2, %c0_7, %c0_8] : memref<4x25x392xf32, #tpu.memory_space<vmem>>, vector<1x25x392xf32>
    %9 = vector.shape_cast %8 : vector<1x25x392xf32> to vector<25x392xf32>
    %cst_9 = arith.constant dense<0.000000e+00> : vector<6x392xf32>
    %10 = tpu.matmul %0, %9, %cst_9 {dimension_numbers = #tpu.dot_dimension_numbers<[1], [0], [0], [1], [0, 0, 1, 1], [], []>} : vector<6x25xf32>, vector<25x392xf32>, vector<6x392xf32> -> vector<6x392xf32>
    %11 = arith.maximumf %7, %10 : vector<6x392xf32>
    %c3 = arith.constant 3 : index
    %c0_10 = arith.constant 0 : index
    %c0_11 = arith.constant 0 : index
    %12 = vector.load %arg0[%c3, %c0_10, %c0_11] : memref<4x25x392xf32, #tpu.memory_space<vmem>>, vector<1x25x392xf32>
    %13 = vector.shape_cast %12 : vector<1x25x392xf32> to vector<25x392xf32>
    %cst_12 = arith.constant dense<0.000000e+00> : vector<6x392xf32>
    %14 = tpu.matmul %0, %13, %cst_12 {dimension_numbers = #tpu.dot_dimension_numbers<[1], [0], [0], [1], [0, 0, 1, 1], [], []>} : vector<6x25xf32>, vector<25x392xf32>, vector<6x392xf32> -> vector<6x392xf32>
    %15 = arith.maximumf %11, %14 : vector<6x392xf32>
    %c0_13 = arith.constant 0 : index
    %c0_14 = arith.constant 0 : index
    %16 = vector.load %arg2[%c0_13, %c0_14] : memref<6x1xf32, #tpu.memory_space<vmem>>, vector<6x1xf32>
    %17 = vector.broadcast %16 : vector<6x1xf32> to vector<6x392xf32>
    %18 = arith.addf %15, %17 : vector<6x392xf32>
    %cst_15 = arith.constant 0.000000e+00 : f32
    %19 = vector.broadcast %cst_15 : f32 to vector<6x392xf32>
    %20 = arith.maximumf %18, %19 : vector<6x392xf32>
    %c0_16 = arith.constant 0 : index
    %c0_17 = arith.constant 0 : index
    %21 = vector.load %arg3[%c0_16, %c0_17] : memref<6x392xf32, #tpu.memory_space<vmem>>, vector<6x392xf32>
    tpu.vector_store %arg3[%c0_16, %c0_17], %20 {strides = array<i32>} : memref<6x392xf32, #tpu.memory_space<vmem>>, vector<6x392xf32>,
    return
  }
}

module attributes {stable_mosaic.version = 11 : i64} {
  func.func @_conv2_pool_fc_kernel(%arg0: memref<4x50x150xf32, #tpu.memory_space<vmem>>, %arg1: memref<150x16xf32, #tpu.memory_space<vmem>>, %arg2: memref<1x16xf32, #tpu.memory_space<vmem>>, %arg3: memref<25x16x120xf32, #tpu.memory_space<vmem>>, %arg4: memref<1x120xf32, #tpu.memory_space<vmem>>, %arg5: memref<120x84xf32, #tpu.memory_space<vmem>>, %arg6: memref<1x84xf32, #tpu.memory_space<vmem>>, %arg7: memref<84x10xf32, #tpu.memory_space<vmem>>, %arg8: memref<1x10xf32, #tpu.memory_space<vmem>>, %arg9: memref<2x10xf32, #tpu.memory_space<vmem>>) attributes {dimension_semantics = [], scalar_prefetch = 0 : i64, scratch_operands = 0 : i64, tpu.core_type = #tpu.core_type<tc>} {
    %c0 = arith.constant 0 : index
    %c0_0 = arith.constant 0 : index
    %0 = vector.load %arg1[%c0, %c0_0] : memref<150x16xf32, #tpu.memory_space<vmem>>, vector<150x16xf32>
    %c0_1 = arith.constant 0 : index
    %c0_2 = arith.constant 0 : index
    %c0_3 = arith.constant 0 : index
    %1 = vector.load %arg0[%c0_1, %c0_2, %c0_3] : memref<4x50x150xf32, #tpu.memory_space<vmem>>, vector<1x50x150xf32>
    %2 = vector.shape_cast %1 : vector<1x50x150xf32> to vector<50x150xf32>
    %cst = arith.constant dense<0.000000e+00> : vector<50x16xf32>
    %3 = tpu.matmul %2, %0, %cst {dimension_numbers = #tpu.dot_dimension_numbers<[1], [0], [0], [1], [0, 0, 1, 1], [], []>} : vector<50x150xf32>, vector<150x16xf32>, vector<50x16xf32> -> vector<50x16xf32>
    %c1 = arith.constant 1 : index
    %c0_4 = arith.constant 0 : index
    %c0_5 = arith.constant 0 : index
    %4 = vector.load %arg0[%c1, %c0_4, %c0_5] : memref<4x50x150xf32, #tpu.memory_space<vmem>>, vector<1x50x150xf32>
    %5 = vector.shape_cast %4 : vector<1x50x150xf32> to vector<50x150xf32>
    %cst_6 = arith.constant dense<0.000000e+00> : vector<50x16xf32>
    %6 = tpu.matmul %5, %0, %cst_6 {dimension_numbers = #tpu.dot_dimension_numbers<[1], [0], [0], [1], [0, 0, 1, 1], [], []>} : vector<50x150xf32>, vector<150x16xf32>, vector<50x16xf32> -> vector<50x16xf32>
    %7 = arith.maximumf %3, %6 : vector<50x16xf32>
    %c2 = arith.constant 2 : index
    %c0_7 = arith.constant 0 : index
    %c0_8 = arith.constant 0 : index
    %8 = vector.load %arg0[%c2, %c0_7, %c0_8] : memref<4x50x150xf32, #tpu.memory_space<vmem>>, vector<1x50x150xf32>
    %9 = vector.shape_cast %8 : vector<1x50x150xf32> to vector<50x150xf32>
    %cst_9 = arith.constant dense<0.000000e+00> : vector<50x16xf32>
    %10 = tpu.matmul %9, %0, %cst_9 {dimension_numbers = #tpu.dot_dimension_numbers<[1], [0], [0], [1], [0, 0, 1, 1], [], []>} : vector<50x150xf32>, vector<150x16xf32>, vector<50x16xf32> -> vector<50x16xf32>
    %11 = arith.maximumf %7, %10 : vector<50x16xf32>
    %c3 = arith.constant 3 : index
    %c0_10 = arith.constant 0 : index
    %c0_11 = arith.constant 0 : index
    %12 = vector.load %arg0[%c3, %c0_10, %c0_11] : memref<4x50x150xf32, #tpu.memory_space<vmem>>, vector<1x50x150xf32>
    %13 = vector.shape_cast %12 : vector<1x50x150xf32> to vector<50x150xf32>
    %cst_12 = arith.constant dense<0.000000e+00> : vector<50x16xf32>
    %14 = tpu.matmul %13, %0, %cst_12 {dimension_numbers = #tpu.dot_dimension_numbers<[1], [0], [0], [1], [0, 0, 1, 1], [], []>} : vector<50x150xf32>, vector<150x16xf32>, vector<50x16xf32> -> vector<50x16xf32>
    %15 = arith.maximumf %11, %14 : vector<50x16xf32>
    %c0_13 = arith.constant 0 : index
    %c0_14 = arith.constant 0 : index
    %16 = vector.load %arg2[%c0_13, %c0_14] : memref<1x16xf32, #tpu.memory_space<vmem>>, vector<1x16xf32>
    %17 = vector.broadcast %16 : vector<1x16xf32> to vector<50x16xf32>
    %18 = arith.addf %15, %17 : vector<50x16xf32>
    %cst_15 = arith.constant 0.000000e+00 : f32
    %19 = vector.broadcast %cst_15 : f32 to vector<50x16xf32>
    %20 = arith.maximumf %18, %19 : vector<50x16xf32>
    %cst_16 = arith.constant 0.000000e+00 : f32
    %21 = vector.broadcast %cst_16 : f32 to vector<2x120xf32>
    %22 = vector.extract_strided_slice %20 {offsets = [0, 0], sizes = [2, 16], strides = [1, 1]} : vector<50x16xf32> to vector<2x16xf32>
    %c0_17 = arith.constant 0 : index
    %c0_18 = arith.constant 0 : index
    %c0_19 = arith.constant 0 : index
    %23 = vector.load %arg3[%c0_17, %c0_18, %c0_19] : memref<25x16x120xf32, #tpu.memory_space<vmem>>, vector<1x16x120xf32>
    %24 = vector.shape_cast %23 : vector<1x16x120xf32> to vector<16x120xf32>
    %cst_20 = arith.constant dense<0.000000e+00> : vector<2x120xf32>
    %25 = tpu.matmul %22, %24, %cst_20 {dimension_numbers = #tpu.dot_dimension_numbers<[1], [0], [0], [1], [0, 0, 1, 1], [], []>} : vector<2x16xf32>, vector<16x120xf32>, vector<2x120xf32> -> vector<2x120xf32>
    %26 = arith.addf %21, %25 : vector<2x120xf32>
    %27 = vector.extract_strided_slice %20 {offsets = [2, 0], sizes = [2, 16], strides = [1, 1]} : vector<50x16xf32> to vector<2x16xf32>
    %c1_21 = arith.constant 1 : index
    %c0_22 = arith.constant 0 : index
    %c0_23 = arith.constant 0 : index
    %28 = vector.load %arg3[%c1_21, %c0_22, %c0_23] : memref<25x16x120xf32, #tpu.memory_space<vmem>>, vector<1x16x120xf32>
    %29 = vector.shape_cast %28 : vector<1x16x120xf32> to vector<16x120xf32>
    %cst_24 = arith.constant dense<0.000000e+00> : vector<2x120xf32>
    %30 = tpu.matmul %27, %29, %cst_24 {dimension_numbers = #tpu.dot_dimension_numbers<[1], [0], [0], [1], [0, 0, 1, 1], [], []>} : vector<2x16xf32>, vector<16x120xf32>, vector<2x120xf32> -> vector<2x120xf32>
    %31 = arith.addf %26, %30 : vector<2x120xf32>
    %32 = vector.extract_strided_slice %20 {offsets = [4, 0], sizes = [2, 16], strides = [1, 1]} : vector<50x16xf32> to vector<2x16xf32>
    %c2_25 = arith.constant 2 : index
    %c0_26 = arith.constant 0 : index
    %c0_27 = arith.constant 0 : index
    %33 = vector.load %arg3[%c2_25, %c0_26, %c0_27] : memref<25x16x120xf32, #tpu.memory_space<vmem>>, vector<1x16x120xf32>
    %34 = vector.shape_cast %33 : vector<1x16x120xf32> to vector<16x120xf32>
    %cst_28 = arith.constant dense<0.000000e+00> : vector<2x120xf32>
    %35 = tpu.matmul %32, %34, %cst_28 {dimension_numbers = #tpu.dot_dimension_numbers<[1], [0], [0], [1], [0, 0, 1, 1], [], []>} : vector<2x16xf32>, vector<16x120xf32>, vector<2x120xf32> -> vector<2x120xf32>
    %36 = arith.addf %31, %35 : vector<2x120xf32>
    %37 = vector.extract_strided_slice %20 {offsets = [6, 0], sizes = [2, 16], strides = [1, 1]} : vector<50x16xf32> to vector<2x16xf32>
    %c3_29 = arith.constant 3 : index
    %c0_30 = arith.constant 0 : index
    %c0_31 = arith.constant 0 : index
    %38 = vector.load %arg3[%c3_29, %c0_30, %c0_31] : memref<25x16x120xf32, #tpu.memory_space<vmem>>, vector<1x16x120xf32>
    %39 = vector.shape_cast %38 : vector<1x16x120xf32> to vector<16x120xf32>
    %cst_32 = arith.constant dense<0.000000e+00> : vector<2x120xf32>
    %40 = tpu.matmul %37, %39, %cst_32 {dimension_numbers = #tpu.dot_dimension_numbers<[1], [0], [0], [1], [0, 0, 1, 1], [], []>} : vector<2x16xf32>, vector<16x120xf32>, vector<2x120xf32> -> vector<2x120xf32>
    %41 = arith.addf %36, %40 : vector<2x120xf32>
    %42 = vector.extract_strided_slice %20 {offsets = [8, 0], sizes = [2, 16], strides = [1, 1]} : vector<50x16xf32> to vector<2x16xf32>
    %c4 = arith.constant 4 : index
    %c0_33 = arith.constant 0 : index
    %c0_34 = arith.constant 0 : index
    %43 = vector.load %arg3[%c4, %c0_33, %c0_34] : memref<25x16x120xf32, #tpu.memory_space<vmem>>, vector<1x16x120xf32>
    %44 = vector.shape_cast %43 : vector<1x16x120xf32> to vector<16x120xf32>
    %cst_35 = arith.constant dense<0.000000e+00> : vector<2x120xf32>
    %45 = tpu.matmul %42, %44, %cst_35 {dimension_numbers = #tpu.dot_dimension_numbers<[1], [0], [0], [1], [0, 0, 1, 1], [], []>} : vector<2x16xf32>, vector<16x120xf32>, vector<2x120xf32> -> vector<2x120xf32>
    %46 = arith.addf %41, %45 : vector<2x120xf32>
    %47 = vector.extract_strided_slice %20 {offsets = [10, 0], sizes = [2, 16], strides = [1, 1]} : vector<50x16xf32> to vector<2x16xf32>
    %c5 = arith.constant 5 : index
    %c0_36 = arith.constant 0 : index
    %c0_37 = arith.constant 0 : index
    %48 = vector.load %arg3[%c5, %c0_36, %c0_37] : memref<25x16x120xf32, #tpu.memory_space<vmem>>, vector<1x16x120xf32>
    %49 = vector.shape_cast %48 : vector<1x16x120xf32> to vector<16x120xf32>
    %cst_38 = arith.constant dense<0.000000e+00> : vector<2x120xf32>
    %50 = tpu.matmul %47, %49, %cst_38 {dimension_numbers = #tpu.dot_dimension_numbers<[1], [0], [0], [1], [0, 0, 1, 1], [], []>} : vector<2x16xf32>, vector<16x120xf32>, vector<2x120xf32> -> vector<2x120xf32>
    %51 = arith.addf %46, %50 : vector<2x120xf32>
    %52 = vector.extract_strided_slice %20 {offsets = [12, 0], sizes = [2, 16], strides = [1, 1]} : vector<50x16xf32> to vector<2x16xf32>
    %c6 = arith.constant 6 : index
    %c0_39 = arith.constant 0 : index
    %c0_40 = arith.constant 0 : index
    %53 = vector.load %arg3[%c6, %c0_39, %c0_40] : memref<25x16x120xf32, #tpu.memory_space<vmem>>, vector<1x16x120xf32>
    %54 = vector.shape_cast %53 : vector<1x16x120xf32> to vector<16x120xf32>
    %cst_41 = arith.constant dense<0.000000e+00> : vector<2x120xf32>
    %55 = tpu.matmul %52, %54, %cst_41 {dimension_numbers = #tpu.dot_dimension_numbers<[1], [0], [0], [1], [0, 0, 1, 1], [], []>} : vector<2x16xf32>, vector<16x120xf32>, vector<2x120xf32> -> vector<2x120xf32>
    %56 = arith.addf %51, %55 : vector<2x120xf32>
    %57 = vector.extract_strided_slice %20 {offsets = [14, 0], sizes = [2, 16], strides = [1, 1]} : vector<50x16xf32> to vector<2x16xf32>
    %c7 = arith.constant 7 : index
    %c0_42 = arith.constant 0 : index
    %c0_43 = arith.constant 0 : index
    %58 = vector.load %arg3[%c7, %c0_42, %c0_43] : memref<25x16x120xf32, #tpu.memory_space<vmem>>, vector<1x16x120xf32>
    %59 = vector.shape_cast %58 : vector<1x16x120xf32> to vector<16x120xf32>
    %cst_44 = arith.constant dense<0.000000e+00> : vector<2x120xf32>
    %60 = tpu.matmul %57, %59, %cst_44 {dimension_numbers = #tpu.dot_dimension_numbers<[1], [0], [0], [1], [0, 0, 1, 1], [], []>} : vector<2x16xf32>, vector<16x120xf32>, vector<2x120xf32> -> vector<2x120xf32>
    %61 = arith.addf %56, %60 : vector<2x120xf32>
    %62 = vector.extract_strided_slice %20 {offsets = [16, 0], sizes = [2, 16], strides = [1, 1]} : vector<50x16xf32> to vector<2x16xf32>
    %c8 = arith.constant 8 : index
    %c0_45 = arith.constant 0 : index
    %c0_46 = arith.constant 0 : index
    %63 = vector.load %arg3[%c8, %c0_45, %c0_46] : memref<25x16x120xf32, #tpu.memory_space<vmem>>, vector<1x16x120xf32>
    %64 = vector.shape_cast %63 : vector<1x16x120xf32> to vector<16x120xf32>
    %cst_47 = arith.constant dense<0.000000e+00> : vector<2x120xf32>
    %65 = tpu.matmul %62, %64, %cst_47 {dimension_numbers = #tpu.dot_dimension_numbers<[1], [0], [0], [1], [0, 0, 1, 1], [], []>} : vector<2x16xf32>, vector<16x120xf32>, vector<2x120xf32> -> vector<2x120xf32>
    %66 = arith.addf %61, %65 : vector<2x120xf32>
    %67 = vector.extract_strided_slice %20 {offsets = [18, 0], sizes = [2, 16], strides = [1, 1]} : vector<50x16xf32> to vector<2x16xf32>
    %c9 = arith.constant 9 : index
    %c0_48 = arith.constant 0 : index
    %c0_49 = arith.constant 0 : index
    %68 = vector.load %arg3[%c9, %c0_48, %c0_49] : memref<25x16x120xf32, #tpu.memory_space<vmem>>, vector<1x16x120xf32>
    %69 = vector.shape_cast %68 : vector<1x16x120xf32> to vector<16x120xf32>
    %cst_50 = arith.constant dense<0.000000e+00> : vector<2x120xf32>
    %70 = tpu.matmul %67, %69, %cst_50 {dimension_numbers = #tpu.dot_dimension_numbers<[1], [0], [0], [1], [0, 0, 1, 1], [], []>} : vector<2x16xf32>, vector<16x120xf32>, vector<2x120xf32> -> vector<2x120xf32>
    %71 = arith.addf %66, %70 : vector<2x120xf32>
    %72 = vector.extract_strided_slice %20 {offsets = [20, 0], sizes = [2, 16], strides = [1, 1]} : vector<50x16xf32> to vector<2x16xf32>
    %c10 = arith.constant 10 : index
    %c0_51 = arith.constant 0 : index
    %c0_52 = arith.constant 0 : index
    %73 = vector.load %arg3[%c10, %c0_51, %c0_52] : memref<25x16x120xf32, #tpu.memory_space<vmem>>, vector<1x16x120xf32>
    %74 = vector.shape_cast %73 : vector<1x16x120xf32> to vector<16x120xf32>
    %cst_53 = arith.constant dense<0.000000e+00> : vector<2x120xf32>
    %75 = tpu.matmul %72, %74, %cst_53 {dimension_numbers = #tpu.dot_dimension_numbers<[1], [0], [0], [1], [0, 0, 1, 1], [], []>} : vector<2x16xf32>, vector<16x120xf32>, vector<2x120xf32> -> vector<2x120xf32>
    %76 = arith.addf %71, %75 : vector<2x120xf32>
    %77 = vector.extract_strided_slice %20 {offsets = [22, 0], sizes = [2, 16], strides = [1, 1]} : vector<50x16xf32> to vector<2x16xf32>
    %c11 = arith.constant 11 : index
    %c0_54 = arith.constant 0 : index
    %c0_55 = arith.constant 0 : index
    %78 = vector.load %arg3[%c11, %c0_54, %c0_55] : memref<25x16x120xf32, #tpu.memory_space<vmem>>, vector<1x16x120xf32>
    %79 = vector.shape_cast %78 : vector<1x16x120xf32> to vector<16x120xf32>
    %cst_56 = arith.constant dense<0.000000e+00> : vector<2x120xf32>
    %80 = tpu.matmul %77, %79, %cst_56 {dimension_numbers = #tpu.dot_dimension_numbers<[1], [0], [0], [1], [0, 0, 1, 1], [], []>} : vector<2x16xf32>, vector<16x120xf32>, vector<2x120xf32> -> vector<2x120xf32>
    %81 = arith.addf %76, %80 : vector<2x120xf32>
    %82 = vector.extract_strided_slice %20 {offsets = [24, 0], sizes = [2, 16], strides = [1, 1]} : vector<50x16xf32> to vector<2x16xf32>
    %c12 = arith.constant 12 : index
    %c0_57 = arith.constant 0 : index
    %c0_58 = arith.constant 0 : index
    %83 = vector.load %arg3[%c12, %c0_57, %c0_58] : memref<25x16x120xf32, #tpu.memory_space<vmem>>, vector<1x16x120xf32>
    %84 = vector.shape_cast %83 : vector<1x16x120xf32> to vector<16x120xf32>
    %cst_59 = arith.constant dense<0.000000e+00> : vector<2x120xf32>
    %85 = tpu.matmul %82, %84, %cst_59 {dimension_numbers = #tpu.dot_dimension_numbers<[1], [0], [0], [1], [0, 0, 1, 1], [], []>} : vector<2x16xf32>, vector<16x120xf32>, vector<2x120xf32> -> vector<2x120xf32>
    %86 = arith.addf %81, %85 : vector<2x120xf32>
    %87 = vector.extract_strided_slice %20 {offsets = [26, 0], sizes = [2, 16], strides = [1, 1]} : vector<50x16xf32> to vector<2x16xf32>
    %c13 = arith.constant 13 : index
    %c0_60 = arith.constant 0 : index
    %c0_61 = arith.constant 0 : index
    %88 = vector.load %arg3[%c13, %c0_60, %c0_61] : memref<25x16x120xf32, #tpu.memory_space<vmem>>, vector<1x16x120xf32>
    %89 = vector.shape_cast %88 : vector<1x16x120xf32> to vector<16x120xf32>
    %cst_62 = arith.constant dense<0.000000e+00> : vector<2x120xf32>
    %90 = tpu.matmul %87, %89, %cst_62 {dimension_numbers = #tpu.dot_dimension_numbers<[1], [0], [0], [1], [0, 0, 1, 1], [], []>} : vector<2x16xf32>, vector<16x120xf32>, vector<2x120xf32> -> vector<2x120xf32>
    %91 = arith.addf %86, %90 : vector<2x120xf32>
    %92 = vector.extract_strided_slice %20 {offsets = [28, 0], sizes = [2, 16], strides = [1, 1]} : vector<50x16xf32> to vector<2x16xf32>
    %c14 = arith.constant 14 : index
    %c0_63 = arith.constant 0 : index
    %c0_64 = arith.constant 0 : index
    %93 = vector.load %arg3[%c14, %c0_63, %c0_64] : memref<25x16x120xf32, #tpu.memory_space<vmem>>, vector<1x16x120xf32>
    %94 = vector.shape_cast %93 : vector<1x16x120xf32> to vector<16x120xf32>
    %cst_65 = arith.constant dense<0.000000e+00> : vector<2x120xf32>
    %95 = tpu.matmul %92, %94, %cst_65 {dimension_numbers = #tpu.dot_dimension_numbers<[1], [0], [0], [1], [0, 0, 1, 1], [], []>} : vector<2x16xf32>, vector<16x120xf32>, vector<2x120xf32> -> vector<2x120xf32>
    %96 = arith.addf %91, %95 : vector<2x120xf32>
    %97 = vector.extract_strided_slice %20 {offsets = [30, 0], sizes = [2, 16], strides = [1, 1]} : vector<50x16xf32> to vector<2x16xf32>
    %c15 = arith.constant 15 : index
    %c0_66 = arith.constant 0 : index
    %c0_67 = arith.constant 0 : index
    %98 = vector.load %arg3[%c15, %c0_66, %c0_67] : memref<25x16x120xf32, #tpu.memory_space<vmem>>, vector<1x16x120xf32>
    %99 = vector.shape_cast %98 : vector<1x16x120xf32> to vector<16x120xf32>
    %cst_68 = arith.constant dense<0.000000e+00> : vector<2x120xf32>
    %100 = tpu.matmul %97, %99, %cst_68 {dimension_numbers = #tpu.dot_dimension_numbers<[1], [0], [0], [1], [0, 0, 1, 1], [], []>} : vector<2x16xf32>, vector<16x120xf32>, vector<2x120xf32> -> vector<2x120xf32>
    %101 = arith.addf %96, %100 : vector<2x120xf32>
    %102 = vector.extract_strided_slice %20 {offsets = [32, 0], sizes = [2, 16], strides = [1, 1]} : vector<50x16xf32> to vector<2x16xf32>
    %c16 = arith.constant 16 : index
    %c0_69 = arith.constant 0 : index
    %c0_70 = arith.constant 0 : index
    %103 = vector.load %arg3[%c16, %c0_69, %c0_70] : memref<25x16x120xf32, #tpu.memory_space<vmem>>, vector<1x16x120xf32>
    %104 = vector.shape_cast %103 : vector<1x16x120xf32> to vector<16x120xf32>
    %cst_71 = arith.constant dense<0.000000e+00> : vector<2x120xf32>
    %105 = tpu.matmul %102, %104, %cst_71 {dimension_numbers = #tpu.dot_dimension_numbers<[1], [0], [0], [1], [0, 0, 1, 1], [], []>} : vector<2x16xf32>, vector<16x120xf32>, vector<2x120xf32> -> vector<2x120xf32>
    %106 = arith.addf %101, %105 : vector<2x120xf32>
    %107 = vector.extract_strided_slice %20 {offsets = [34, 0], sizes = [2, 16], strides = [1, 1]} : vector<50x16xf32> to vector<2x16xf32>
    %c17 = arith.constant 17 : index
    %c0_72 = arith.constant 0 : index
    %c0_73 = arith.constant 0 : index
    %108 = vector.load %arg3[%c17, %c0_72, %c0_73] : memref<25x16x120xf32, #tpu.memory_space<vmem>>, vector<1x16x120xf32>
    %109 = vector.shape_cast %108 : vector<1x16x120xf32> to vector<16x120xf32>
    %cst_74 = arith.constant dense<0.000000e+00> : vector<2x120xf32>
    %110 = tpu.matmul %107, %109, %cst_74 {dimension_numbers = #tpu.dot_dimension_numbers<[1], [0], [0], [1], [0, 0, 1, 1], [], []>} : vector<2x16xf32>, vector<16x120xf32>, vector<2x120xf32> -> vector<2x120xf32>
    %111 = arith.addf %106, %110 : vector<2x120xf32>
    %112 = vector.extract_strided_slice %20 {offsets = [36, 0], sizes = [2, 16], strides = [1, 1]} : vector<50x16xf32> to vector<2x16xf32>
    %c18 = arith.constant 18 : index
    %c0_75 = arith.constant 0 : index
    %c0_76 = arith.constant 0 : index
    %113 = vector.load %arg3[%c18, %c0_75, %c0_76] : memref<25x16x120xf32, #tpu.memory_space<vmem>>, vector<1x16x120xf32>
    %114 = vector.shape_cast %113 : vector<1x16x120xf32> to vector<16x120xf32>
    %cst_77 = arith.constant dense<0.000000e+00> : vector<2x120xf32>
    %115 = tpu.matmul %112, %114, %cst_77 {dimension_numbers = #tpu.dot_dimension_numbers<[1], [0], [0], [1], [0, 0, 1, 1], [], []>} : vector<2x16xf32>, vector<16x120xf32>, vector<2x120xf32> -> vector<2x120xf32>
    %116 = arith.addf %111, %115 : vector<2x120xf32>
    %117 = vector.extract_strided_slice %20 {offsets = [38, 0], sizes = [2, 16], strides = [1, 1]} : vector<50x16xf32> to vector<2x16xf32>
    %c19 = arith.constant 19 : index
    %c0_78 = arith.constant 0 : index
    %c0_79 = arith.constant 0 : index
    %118 = vector.load %arg3[%c19, %c0_78, %c0_79] : memref<25x16x120xf32, #tpu.memory_space<vmem>>, vector<1x16x120xf32>
    %119 = vector.shape_cast %118 : vector<1x16x120xf32> to vector<16x120xf32>
    %cst_80 = arith.constant dense<0.000000e+00> : vector<2x120xf32>
    %120 = tpu.matmul %117, %119, %cst_80 {dimension_numbers = #tpu.dot_dimension_numbers<[1], [0], [0], [1], [0, 0, 1, 1], [], []>} : vector<2x16xf32>, vector<16x120xf32>, vector<2x120xf32> -> vector<2x120xf32>
    %121 = arith.addf %116, %120 : vector<2x120xf32>
    %122 = vector.extract_strided_slice %20 {offsets = [40, 0], sizes = [2, 16], strides = [1, 1]} : vector<50x16xf32> to vector<2x16xf32>
    %c20 = arith.constant 20 : index
    %c0_81 = arith.constant 0 : index
    %c0_82 = arith.constant 0 : index
    %123 = vector.load %arg3[%c20, %c0_81, %c0_82] : memref<25x16x120xf32, #tpu.memory_space<vmem>>, vector<1x16x120xf32>
    %124 = vector.shape_cast %123 : vector<1x16x120xf32> to vector<16x120xf32>
    %cst_83 = arith.constant dense<0.000000e+00> : vector<2x120xf32>
    %125 = tpu.matmul %122, %124, %cst_83 {dimension_numbers = #tpu.dot_dimension_numbers<[1], [0], [0], [1], [0, 0, 1, 1], [], []>} : vector<2x16xf32>, vector<16x120xf32>, vector<2x120xf32> -> vector<2x120xf32>
    %126 = arith.addf %121, %125 : vector<2x120xf32>
    %127 = vector.extract_strided_slice %20 {offsets = [42, 0], sizes = [2, 16], strides = [1, 1]} : vector<50x16xf32> to vector<2x16xf32>
    %c21 = arith.constant 21 : index
    %c0_84 = arith.constant 0 : index
    %c0_85 = arith.constant 0 : index
    %128 = vector.load %arg3[%c21, %c0_84, %c0_85] : memref<25x16x120xf32, #tpu.memory_space<vmem>>, vector<1x16x120xf32>
    %129 = vector.shape_cast %128 : vector<1x16x120xf32> to vector<16x120xf32>
    %cst_86 = arith.constant dense<0.000000e+00> : vector<2x120xf32>
    %130 = tpu.matmul %127, %129, %cst_86 {dimension_numbers = #tpu.dot_dimension_numbers<[1], [0], [0], [1], [0, 0, 1, 1], [], []>} : vector<2x16xf32>, vector<16x120xf32>, vector<2x120xf32> -> vector<2x120xf32>
    %131 = arith.addf %126, %130 : vector<2x120xf32>
    %132 = vector.extract_strided_slice %20 {offsets = [44, 0], sizes = [2, 16], strides = [1, 1]} : vector<50x16xf32> to vector<2x16xf32>
    %c22 = arith.constant 22 : index
    %c0_87 = arith.constant 0 : index
    %c0_88 = arith.constant 0 : index
    %133 = vector.load %arg3[%c22, %c0_87, %c0_88] : memref<25x16x120xf32, #tpu.memory_space<vmem>>, vector<1x16x120xf32>
    %134 = vector.shape_cast %133 : vector<1x16x120xf32> to vector<16x120xf32>
    %cst_89 = arith.constant dense<0.000000e+00> : vector<2x120xf32>
    %135 = tpu.matmul %132, %134, %cst_89 {dimension_numbers = #tpu.dot_dimension_numbers<[1], [0], [0], [1], [0, 0, 1, 1], [], []>} : vector<2x16xf32>, vector<16x120xf32>, vector<2x120xf32> -> vector<2x120xf32>
    %136 = arith.addf %131, %135 : vector<2x120xf32>
    %137 = vector.extract_strided_slice %20 {offsets = [46, 0], sizes = [2, 16], strides = [1, 1]} : vector<50x16xf32> to vector<2x16xf32>
    %c23 = arith.constant 23 : index
    %c0_90 = arith.constant 0 : index
    %c0_91 = arith.constant 0 : index
    %138 = vector.load %arg3[%c23, %c0_90, %c0_91] : memref<25x16x120xf32, #tpu.memory_space<vmem>>, vector<1x16x120xf32>
    %139 = vector.shape_cast %138 : vector<1x16x120xf32> to vector<16x120xf32>
    %cst_92 = arith.constant dense<0.000000e+00> : vector<2x120xf32>
    %140 = tpu.matmul %137, %139, %cst_92 {dimension_numbers = #tpu.dot_dimension_numbers<[1], [0], [0], [1], [0, 0, 1, 1], [], []>} : vector<2x16xf32>, vector<16x120xf32>, vector<2x120xf32> -> vector<2x120xf32>
    %141 = arith.addf %136, %140 : vector<2x120xf32>
    %142 = vector.extract_strided_slice %20 {offsets = [48, 0], sizes = [2, 16], strides = [1, 1]} : vector<50x16xf32> to vector<2x16xf32>
    %c24 = arith.constant 24 : index
    %c0_93 = arith.constant 0 : index
    %c0_94 = arith.constant 0 : index
    %143 = vector.load %arg3[%c24, %c0_93, %c0_94] : memref<25x16x120xf32, #tpu.memory_space<vmem>>, vector<1x16x120xf32>
    %144 = vector.shape_cast %143 : vector<1x16x120xf32> to vector<16x120xf32>
    %cst_95 = arith.constant dense<0.000000e+00> : vector<2x120xf32>
    %145 = tpu.matmul %142, %144, %cst_95 {dimension_numbers = #tpu.dot_dimension_numbers<[1], [0], [0], [1], [0, 0, 1, 1], [], []>} : vector<2x16xf32>, vector<16x120xf32>, vector<2x120xf32> -> vector<2x120xf32>
    %146 = arith.addf %141, %145 : vector<2x120xf32>
    %c0_96 = arith.constant 0 : index
    %c0_97 = arith.constant 0 : index
    %147 = vector.load %arg4[%c0_96, %c0_97] : memref<1x120xf32, #tpu.memory_space<vmem>>, vector<1x120xf32>
    %148 = vector.broadcast %147 : vector<1x120xf32> to vector<2x120xf32>
    %149 = arith.addf %146, %148 : vector<2x120xf32>
    %cst_98 = arith.constant 0.000000e+00 : f32
    %150 = vector.broadcast %cst_98 : f32 to vector<2x120xf32>
    %151 = arith.maximumf %149, %150 : vector<2x120xf32>
    %c0_99 = arith.constant 0 : index
    %c0_100 = arith.constant 0 : index
    %152 = vector.load %arg5[%c0_99, %c0_100] : memref<120x84xf32, #tpu.memory_space<vmem>>, vector<120x84xf32>
    %cst_101 = arith.constant dense<0.000000e+00> : vector<2x84xf32>
    %153 = tpu.matmul %151, %152, %cst_101 {dimension_numbers = #tpu.dot_dimension_numbers<[1], [0], [0], [1], [0, 0, 1, 1], [], []>} : vector<2x120xf32>, vector<120x84xf32>, vector<2x84xf32> -> vector<2x84xf32>
    %c0_102 = arith.constant 0 : index
    %c0_103 = arith.constant 0 : index
    %154 = vector.load %arg6[%c0_102, %c0_103] : memref<1x84xf32, #tpu.memory_space<vmem>>, vector<1x84xf32>
    %155 = vector.broadcast %154 : vector<1x84xf32> to vector<2x84xf32>
    %156 = arith.addf %153, %155 : vector<2x84xf32>
    %cst_104 = arith.constant 0.000000e+00 : f32
    %157 = vector.broadcast %cst_104 : f32 to vector<2x84xf32>
    %158 = arith.maximumf %156, %157 : vector<2x84xf32>
    %c0_105 = arith.constant 0 : index
    %c0_106 = arith.constant 0 : index
    %159 = vector.load %arg7[%c0_105, %c0_106] : memref<84x10xf32, #tpu.memory_space<vmem>>, vector<84x10xf32>
    %cst_107 = arith.constant dense<0.000000e+00> : vector<2x10xf32>
    %160 = tpu.matmul %158, %159, %cst_107 {dimension_numbers = #tpu.dot_dimension_numbers<[1], [0], [0], [1], [0, 0, 1, 1], [], []>} : vector<2x84xf32>, vector<84x10xf32>, vector<2x10xf32> -> vector<2x10xf32>
    %c0_108 = arith.constant 0 : index
    %c0_109 = arith.constant 0 : index
    %161 = vector.load %arg8[%c0_108, %c0_109] : memref<1x10xf32, #tpu.memory_space<vmem>>, vector<1x10xf32>
    %162 = vector.broadcast %161 : vector<1x10xf32> to vector<2x10xf32>
    %163 = arith.addf %160, %162 : vector<2x10xf32>
    %c0_110 = arith.constant 0 : index
    %c0_111 = arith.constant 0 : index
    %164 = vector.load %arg9[%c0_110, %c0_111] : memref<2x10xf32, #tpu.memory_space<vmem>>, vector<2x10xf32>
    tpu.vector_store %arg9[%c0_110, %c0_111], %163 {strides = array<i32>} : memref<2x10xf32, #tpu.memory_space<vmem>>, vector<2x10xf32>,
    return
  }
}

</mosaic_0001>

<bundles_post_ra>
// kernel: lenet_forward.2
= control target key start
LH: loop header
LB: loop body
LE: loop exit
PB: predicated region body
PF: predicated region fallthrough
CT: control target
= control target key end

     0   :  { %vm35_vm0 = vcmask 1040384   ;;  %v894_v3 = vmov 0.0   ;;  %v895_v8 = vmov 0   ;;  %vm896_vm1 = vmmov 1   ;;  %s1190_s0 = inlined_call_operand.vmem [shape: f32[4,25,392], index: 0, kind: input, shape index: {}]   ;;  %s1191_s1 = inlined_call_operand.vmem [shape: f32[6,25], index: 1, kind: input, shape index: {}]   ;;  %s1192_s2 = inlined_call_operand.vmem [shape: f32[6,1], index: 2, kind: input, shape index: {}]   ;;  %s1193_s3 = inlined_call_operand.vmem [shape: f32[6,392], index: 3, kind: output, shape index: {}]  }
   0x1   :  { %v16_v0 = vld [vmem:[%s1190_s0 + $0x8] sm:$0xff]  ;;  %v18_v2 = vld [vmem:[%s1190_s0 + $0x18] sm:$0xff]  ;;  %112 = vmatprep.mubr.f32.mxu0 %v894_v3  ;;  %183 = vmatprep.mubr.f32.mxu1 %v894_v3  ;;  %v15_v6 = vld [vmem:[%s1190_s0] sm:$0xff]  ;;  %vm31_vm3 = vcmask 203776   ;;  %vm732_vm4 = vcmask 62464  }
   0x2   :  { %v20_v1 = vld [vmem:[%s1190_s0 + $0x28] sm:$0xff]  ;;  %v22_v5 = vld [vmem:[%s1190_s0 + $0x38] sm:$0xff]  ;;  %v19_v7 = vld [vmem:[%s1190_s0 + $0x20] sm:$0xff]  ;;  %893 = vset.pattern.permute.xlu0 %v895_v8 }
   0x3   :  { %v810_v4 = vpack.c.bf16 %v20_v1, %v16_v0  ;;  %v820_v9 = vpack.c.bf16 %v22_v5, %v18_v2  ;;  %v812_v10 = vpack.c.bf16 %v19_v7, %v15_v6  ;;  %v17_v11 = vld [vmem:[%s1190_s0 + $0x10] sm:$0xff]  ;;  %v24_v13 = vld [vmem:[%s1190_s0 + $0x48] sm:$0xff]  ;;  %vm950_vm2 = vmpackc.low %vm35_vm0, %vm896_vm1 }
   0x4   :  { %v21_v12 = vld [vmem:[%s1190_s0 + $0x30] sm:$0xff]  ;;  %v28_v15 = vld [vmem:[%s1190_s0 + $0x68] sm:$0x1]  ;;  %v26_v17 = vld [vmem:[%s1190_s0 + $0x58] sm:$0xff] }
   0x5   :  { %811 = vmatprep.subr.bf16.mxu0 %v810_v4  ;;  %v822_v14 = vpack.c.bf16 %v21_v12, %v17_v11  ;;  %821 = vmatprep.subr.bf16.mxu1 %v820_v9  ;;  %v814_v18 = vpack.c.bf16 %v28_v15, %v24_v13  ;;  %v30_v19 = vld [vmem:[%s1190_s0 + $0x78] sm:$0x1]  ;;  %v23_v20 = vld [vmem:[%s1190_s0 + $0x40] sm:$0xff]  ;;  %v25_v24 = vld [vmem:[%s1190_s0 + $0x50] sm:$0xff] }
   0x6   :  { %813 = vmatpush1.bf16.msra.mxu0 %v812_v10  ;;  %v27_v21 = vld [vmem:[%s1190_s0 + $0x60] sm:$0x1]  ;;  %v824_v22 = vpack.c.bf16 %v30_v19, %v26_v17  ;;  %v29_v25 = vld [vmem:[%s1190_s0 + $0x70] sm:$0x1]  ;;  %v745_v28 = vld [vmem:[%s1190_s0 + $0x88] sm:$0xff] }
   0x7   :  { %823 = vmatpush1.bf16.msra.mxu1 %v822_v14  ;;  %v817_v23 = vpack.c.bf16 %v27_v21, %v23_v20  ;;  %816 = vmatprep.subr.msk.bf16.mxu0 %vm950_vm2, %v814_v18  ;;  %v827_v26 = vpack.c.bf16 %v29_v25, %v25_v24  ;;  %v977_v27 = vld [vmem:[%s1191_s1] sm:$0x3f]  ;;  %v749_v29 = vld [vmem:[%s1190_s0 + $0xa8] sm:$0xff]  ;;  %v747_v30 = vld [vmem:[%s1190_s0 + $0x98] sm:$0xff] }
   0x8   :  { %826 = vmatprep.subr.msk.bf16.mxu1 %vm950_vm2, %v824_v22  ;;  %v830_v31 = vpack.c.bf16 %v749_v29, %v745_v28  ;;  %v751_v32 = vld [vmem:[%s1190_s0 + $0xb8] sm:$0xff]  ;;  %v744_v33 = vld [vmem:[%s1190_s0 + $0x80] sm:$0xff]  ;;  %v746_v37 = vld [vmem:[%s1190_s0 + $0x90] sm:$0xff] }
   0x9   :  { %v748_v34 = vld [vmem:[%s1190_s0 + $0xa0] sm:$0xff]  ;;  %v840_v35 = vpack.c.bf16 %v751_v32, %v747_v30  ;;  %v750_v38 = vld [vmem:[%s1190_s0 + $0xb0] sm:$0xff]  ;;  %v753_v39 = vld [vmem:[%s1190_s0 + $0xc8] sm:$0xff] }
   0xa   :  { %819 = vmatpush1.bf16.msk.msra.mxu0 %vm950_vm2, %v817_v23  ;;  %v832_v36 = vpack.c.bf16 %v748_v34, %v744_v33  ;;  %v842_v40 = vpack.c.bf16 %v750_v38, %v746_v37  ;;  %v757_v41 = vld [vmem:[%s1190_s0 + $0xe8] sm:$0x1]  ;;  %v755_v42 = vld [vmem:[%s1190_s0 + $0xd8] sm:$0xff]  ;;  %v752_v46 = vld [vmem:[%s1190_s0 + $0xc0] sm:$0xff] }
   0xb   :  { %829 = vmatpush1.bf16.msk.msra.mxu1 %vm950_vm2, %v827_v26  ;;  %831 = vmatprep.subr.bf16.mxu0 %v830_v31  ;;  %v759_v43 = vld [vmem:[%s1190_s0 + $0xf8] sm:$0x1]  ;;  %v834_v44 = vpack.c.bf16 %v757_v41, %v753_v39  ;;  %v756_v47 = vld [vmem:[%s1190_s0 + $0xe0] sm:$0x1]  ;;  %v754_v48 = vld [vmem:[%s1190_s0 + $0xd0] sm:$0xff] }
   0xc   :  { %841 = vmatprep.subr.bf16.mxu1 %v840_v35  ;;  %v844_v45 = vpack.c.bf16 %v759_v43, %v755_v42  ;;  %v758_v49 = vld [vmem:[%s1190_s0 + $0xf0] sm:$0x1]  ;;  %v767_v50 = vld [vmem:[%s1190_s0 + $0x108] sm:$0xff]  ;;  %v837_v52 = vpack.c.bf16 %v756_v47, %v752_v46  ;;  %v769_v53 = vld [vmem:[%s1190_s0 + $0x118] sm:$0xff] }
   0xd   :  { %740 = vmatmul.mubr.msk.f32.vlgmr.msra.gmra.mrb[0].mxu0 %vm31_vm3, %v977_v27  ;;  %v771_v51 = vld [vmem:[%s1190_s0 + $0x128] sm:$0xff]  ;;  %v773_v54 = vld [vmem:[%s1190_s0 + $0x138] sm:$0xff]  ;;  %v847_v55 = vpack.c.bf16 %v758_v49, %v754_v48  ;;  %v766_v57 = vld [vmem:[%s1190_s0 + $0x100] sm:$0xff] }
   0xe   :  { %743 = vmatmul.mubr.msk.f32.vlgmr.msra.gmra.mrb[0].mxu1 %vm31_vm3, %v977_v27  ;;  %833 = vmatpush1.bf16.msra.mxu0 %v832_v36  ;;  %v850_v56 = vpack.c.bf16 %v771_v51, %v767_v50  ;;  %v770_v58 = vld [vmem:[%s1190_s0 + $0x120] sm:$0xff]  ;;  %v768_v59 = vld [vmem:[%s1190_s0 + $0x110] sm:$0xff]  ;;  %v860_v60 = vpack.c.bf16 %v773_v54, %v769_v53  ;;  %v775_v62 = vld [vmem:[%s1190_s0 + $0x148] sm:$0xff] }
   0xf   :  { %843 = vmatpush1.bf16.msra.mxu1 %v842_v40  ;;  %836 = vmatprep.subr.msk.bf16.mxu0 %vm950_vm2, %v834_v44  ;;  %v772_v61 = vld [vmem:[%s1190_s0 + $0x130] sm:$0xff]  ;;  %v779_v63 = vld [vmem:[%s1190_s0 + $0x168] sm:$0x1]  ;;  %v777_v0 = vld [vmem:[%s1190_s0 + $0x158] sm:$0xff]  ;;  %v852_v2 = vpack.c.bf16 %v770_v58, %v766_v57 }
  0x10   :  { %846 = vmatprep.subr.msk.bf16.mxu1 %vm950_vm2, %v844_v45  ;;  %283 = vmatprep.mubr.f32.mxu0 %v894_v3  ;;  %v781_v1 = vld [vmem:[%s1190_s0 + $0x178] sm:$0x1]  ;;  %v862_v4 = vpack.c.bf16 %v772_v61, %v768_v59  ;;  %v854_v5 = vpack.c.bf16 %v779_v63, %v775_v62  ;;  %v774_v6 = vld [vmem:[%s1190_s0 + $0x140] sm:$0xff]  ;;  %v776_v8 = vld [vmem:[%s1190_s0 + $0x150] sm:$0xff] }
  0x11   :  { %354 = vmatprep.mubr.f32.mxu1 %v894_v3  ;;  %v778_v7 = vld [vmem:[%s1190_s0 + $0x160] sm:$0x1]  ;;  %v864_v9 = vpack.c.bf16 %v781_v1, %v777_v0  ;;  %v780_v10 = vld [vmem:[%s1190_s0 + $0x170] sm:$0x1]  ;;  %v789_v11 = vld [vmem:[%s1190_s0 + $0x188] sm:$0xff] }
  0x12   :  { %839 = vmatpush1.bf16.msk.msra.mxu0 %vm950_vm2, %v837_v52  ;;  %v793_v12 = vld [vmem:[%s1190_s0 + $0x1a8] sm:$0xff]  ;;  %v791_v13 = vld [vmem:[%s1190_s0 + $0x198] sm:$0xff]  ;;  %v857_v15 = vpack.c.bf16 %v778_v7, %v774_v6  ;;  %v788_v17 = vld [vmem:[%s1190_s0 + $0x180] sm:$0xff]  ;;  %v867_v18 = vpack.c.bf16 %v780_v10, %v776_v8 }
  0x13   :  { %849 = vmatpush1.bf16.msk.msra.mxu1 %vm950_vm2, %v847_v55  ;;  %851 = vmatprep.subr.bf16.mxu0 %v850_v56  ;;  %v795_v14 = vld [vmem:[%s1190_s0 + $0x1b8] sm:$0xff]  ;;  %v870_v19 = vpack.c.bf16 %v793_v12, %v789_v11  ;;  %v792_v20 = vld [vmem:[%s1190_s0 + $0x1a0] sm:$0xff]  ;;  %v790_v21 = vld [vmem:[%s1190_s0 + $0x190] sm:$0xff] }
  0x14   :  { %861 = vmatprep.subr.bf16.mxu1 %v860_v60  ;;  %v794_v22 = vld [vmem:[%s1190_s0 + $0x1b0] sm:$0xff]  ;;  %v880_v23 = vpack.c.bf16 %v795_v14, %v791_v13  ;;  %v797_v24 = vld [vmem:[%s1190_s0 + $0x1c8] sm:$0xff]  ;;  %v715_v26 = vld [vmem:[%s1192_s2] sm:$0x3f]  ;;  %v872_v30 = vpack.c.bf16 %v792_v20, %v788_v17 }
  0x15   :  { %762 = vmatmul.mubr.msk.f32.vlgmr.msra.gmra.mrb[2].mxu0 %vm31_vm3, %v977_v27  ;;  %v801_v25 = vld [vmem:[%s1190_s0 + $0x1e8] sm:$0x1]  ;;  %v799_v28 = vld [vmem:[%s1190_s0 + $0x1d8] sm:$0xff]  ;;  %718 = vperm.xlu0 %893, %v715_v26   ;;  %v882_v31 = vpack.c.bf16 %v794_v22, %v790_v21  ;;  %v796_v33 = vld [vmem:[%s1190_s0 + $0x1c0] sm:$0xff] }
  0x16   :  { %765 = vmatmul.mubr.msk.f32.vlgmr.msra.gmra.mrb[2].mxu1 %vm31_vm3, %v977_v27  ;;  %853 = vmatpush1.bf16.msra.mxu0 %v852_v2  ;;  %v803_v29 = vld [vmem:[%s1190_s0 + $0x1f8] sm:$0x1]  ;;  %v874_v32 = vpack.c.bf16 %v801_v25, %v797_v24  ;;  %v800_v34 = vld [vmem:[%s1190_s0 + $0x1e0] sm:$0x1]  ;;  %v798_v36 = vld [vmem:[%s1190_s0 + $0x1d0] sm:$0xff] }
  0x17   :  { %863 = vmatpush1.bf16.msra.mxu1 %v862_v4  ;;  %856 = vmatprep.subr.msk.bf16.mxu0 %vm950_vm2, %v854_v5  ;;  %v884_v35 = vpack.c.bf16 %v803_v29, %v799_v28  ;;  %v802_v37 = vld [vmem:[%s1190_s0 + $0x1f0] sm:$0x1]  ;;  %v877_v38 = vpack.c.bf16 %v800_v34, %v796_v33 }
  0x18   :  { %866 = vmatprep.subr.msk.bf16.mxu1 %vm950_vm2, %v864_v9  ;;  %458 = vmatprep.mubr.f32.mxu0 %v894_v3  ;;  %v887_v39 = vpack.c.bf16 %v802_v37, %v798_v36 }
  0x19   :  { %529 = vmatprep.mubr.f32.mxu1 %v894_v3 }
  0x1a   :  { %859 = vmatpush1.bf16.msk.msra.mxu0 %vm950_vm2, %v857_v15 }
  0x1b   :  { %869 = vmatpush1.bf16.msk.msra.mxu1 %vm950_vm2, %v867_v18  ;;  %871 = vmatprep.subr.bf16.mxu0 %v870_v19 }
  0x1c   :  { %881 = vmatprep.subr.bf16.mxu1 %v880_v23 }
  0x1d   :  { %784 = vmatmul.mubr.msk.f32.vlgmr.msra.gmra.mrb[4].mxu0 %vm31_vm3, %v977_v27 }
  0x1e   :  { %787 = vmatmul.mubr.msk.f32.vlgmr.msra.gmra.mrb[4].mxu1 %vm31_vm3, %v977_v27  ;;  %873 = vmatpush1.bf16.msra.mxu0 %v872_v30 }
  0x1f   :  { %883 = vmatpush1.bf16.msra.mxu1 %v882_v31  ;;  %876 = vmatprep.subr.msk.bf16.mxu0 %vm950_vm2, %v874_v32 }
  0x20   :  { %886 = vmatprep.subr.msk.bf16.mxu1 %vm950_vm2, %v884_v35  ;;  %633 = vmatprep.mubr.f32.mxu0 %v894_v3 }
  0x21   :  { %704 = vmatprep.mubr.f32.mxu1 %v894_v3 }
  0x22   :  { %879 = vmatpush1.bf16.msk.msra.mxu0 %vm950_vm2, %v877_v38 }
  0x23   :  { %889 = vmatpush1.bf16.msk.msra.mxu1 %vm950_vm2, %v887_v39 }
  0x25   :  { %806 = vmatmul.mubr.msk.f32.vlgmr.msra.gmra.mrb[6].mxu0 %vm31_vm3, %v977_v27 }
  0x26   :  { %809 = vmatmul.mubr.msk.f32.vlgmr.msra.gmra.mrb[6].mxu1 %vm31_vm3, %v977_v27 }
  0x94   :  { %v719_v58 = vpop.permute.xlu0 %718 }
  0xe0   :  { %v114_v40 = vpop.f32.mrb[0].mxu0 }
  0xe1   :  { %v185_v41 = vpop.f32.mrb[0].mxu1  ;;  %v116_v42 = vpop.f32.mrb[1].mxu0 }
  0xe2   :  { %v187_v43 = vpop.f32.mrb[1].mxu1 }
  0xe8   :  { %v285_v44 = vpop.f32.mrb[2].mxu0 }
  0xe9   :  { %v361_v45 = vmax.f32 %v114_v40, %v285_v44  ;;  %v356_v46 = vpop.f32.mrb[2].mxu1  ;;  %v287_v3 = vpop.f32.mrb[3].mxu0 }
  0xea   :  { %v363_v47 = vmax.f32 %v185_v41, %v356_v46  ;;  %v362_v48 = vmax.f32 %v116_v42, %v287_v3  ;;  %v358_v49 = vpop.f32.mrb[3].mxu1 }
  0xeb   :  { %v364_v50 = vmax.f32 %v187_v43, %v358_v49 }
  0xf0   :  { %v460_v16 = vpop.f32.mrb[4].mxu0 }
  0xf1   :  { %v536_v51 = vmax.f32 %v361_v45, %v460_v16  ;;  %v531_v52 = vpop.f32.mrb[4].mxu1  ;;  %v462_v53 = vpop.f32.mrb[5].mxu0 }
  0xf2   :  { %v538_v54 = vmax.f32 %v363_v47, %v531_v52  ;;  %v537_v55 = vmax.f32 %v362_v48, %v462_v53  ;;  %v533_v56 = vpop.f32.mrb[5].mxu1 }
  0xf3   :  { %v539_v27 = vmax.f32 %v364_v50, %v533_v56 }
  0xf8   :  { %v635_v57 = vpop.f32.mrb[6].mxu0 }
  0xf9   :  { %v711_v59 = vmax.f32 %v536_v51, %v635_v57  ;;  %v706_v60 = vpop.f32.mrb[6].mxu1  ;;  %v637_v61 = vpop.f32.mrb[7].mxu0 }
  0xfa   :  { %v713_v62 = vmax.f32 %v538_v54, %v706_v60  ;;  %v712_v63 = vmax.f32 %v537_v55, %v637_v61  ;;  %v708_v0 = vpop.f32.mrb[7].mxu1 }
  0xfb   :  { %v714_v1 = vmax.f32 %v539_v27, %v708_v0  ;;  %v721_v2 = vadd.f32 %v719_v58, %v711_v59 }
  0xfc   :  { %v722_v4 = vadd.f32 %v719_v58, %v712_v63  ;;  %v723_v5 = vadd.f32 %v719_v58, %v713_v62 }
  0xfd   :  { %v724_v6 = vadd.f32 %v719_v58, %v714_v1  ;;  %v725_v7 = vmax.f32 %v721_v2, 0.0 }
  0xfe   :  { %v726_v8 = vmax.f32 %v722_v4, 0.0  ;;  %v727_v9 = vmax.f32 %v723_v5, 0.0 }
  0xff   :  { %v728_v10 = vmax.f32 %v724_v6, 0.0  ;;  %729 = vst [vmem:[%s1193_s3] sm:$0x3f] %v725_v7 }
 0x100   :  { %730 = vst [vmem:[%s1193_s3 + $0x8] sm:$0x3f] %v726_v8  ;;  %731 = vst [vmem:[%s1193_s3 + $0x10] sm:$0x3f] %v727_v9 }
 0x101   :  { %733 = vst.msk [vmem:[%s1193_s3 + $0x18] sm:$0x3f] %vm732_vm4, %v728_v10 }

// kernel: lenet_forward.3
= control target key start
LH: loop header
LB: loop body
LE: loop exit
PB: predicated region body
PF: predicated region fallthrough
CT: control target
= control target key end

     0   :  { %v3520_v3 = vmov 0.0|0.0   ;;  %vm66_vm0 = vcmask 179200   ;;  %s4385_s0 = inlined_call_operand.vmem [shape: f32[4,50,150], index: 0, kind: input, shape index: {}]   ;;  %s4386_s1 = inlined_call_operand.vmem [shape: f32[150,16], index: 1, kind: input, shape index: {}]   ;;  %s4387_s2 = inlined_call_operand.vmem [shape: f32[1,16], index: 2, kind: input, shape index: {}]   ;;  %s4388_s3 = inlined_call_operand.vmem [shape: f32[25,16,120], index: 3, kind: input, shape index: {}]   ;;  %s4389_s4 = inlined_call_operand.vmem [shape: f32[1,120], index: 4, kind: input, shape index: {}]   ;;  %s4390_s5 = inlined_call_operand.vmem [shape: f32[120,84], index: 5, kind: input, shape index: {}]   ;;  %s4391_s6 = inlined_call_operand.vmem [shape: f32[1,84], index: 6, kind: input, shape index: {}]   ;;  %s4392_s7 = inlined_call_operand.vmem [shape: f32[84,10], index: 7, kind: input, shape index: {}]   ;;  %s4393_s8 = inlined_call_operand.vmem [shape: f32[1,10], index: 8, kind: input, shape index: {}]   ;;  %s4394_s9 = inlined_call_operand.hbm [shape: f32[2,10], index: 9, kind: output, shape index: {}]  }
   0x1   :  { %v33_v0 = vld [vmem:[%s4386_s1] sm:$0xff]  ;;  %v34_v1 = vld [vmem:[%s4386_s1 + $0x8] sm:$0xff]  ;;  %v35_v2 = vld [vmem:[%s4386_s1 + $0x10] sm:$0xff]  ;;  %3273 = vmatprep.subr.bf16.mxu0 %v3520_v3  ;;  %3300 = vmatprep.subr.bf16.mxu1 %v3520_v3 }
   0x2   :  { %v3584_v4 = vpack.c.bf16 %v34_v1, %v33_v0  ;;  %v36_v5 = vld [vmem:[%s4386_s1 + $0x18] sm:$0xff]  ;;  %v37_v7 = vld [vmem:[%s4386_s1 + $0x20] sm:$0xff]  ;;  %v38_v8 = vld [vmem:[%s4386_s1 + $0x28] sm:$0xff] }
   0x3   :  { %v3592_v6 = vpack.c.bf16 %v36_v5, %v35_v2  ;;  %v53_v9 = vld [vmem:[%s4385_s0 + $0x8] sm:$0xff]  ;;  %v3607_v10 = vpack.c.bf16 %v38_v8, %v37_v7  ;;  %v2792_v11 = vld [vmem:[%s4385_s0 + $0x78] sm:$0xff]  ;;  %v39_v12 = vld [vmem:[%s4386_s1 + $0x30] sm:$0xff] }
   0x4   :  { %3275 = vmatpush1.bf16.msra.mxu0 %v3584_v4  ;;  %3302 = vmatpush1.bf16.msra.mxu1 %v3584_v4  ;;  %v40_v13 = vld [vmem:[%s4386_s1 + $0x38] sm:$0xff]  ;;  %v41_v15 = vld [vmem:[%s4386_s1 + $0x40] sm:$0xff]  ;;  %v42_v16 = vld [vmem:[%s4386_s1 + $0x48] sm:$0xff] }
   0x5   :  { %3276 = vmatprep.subr.bf16.mxu0 %v3520_v3  ;;  %3303 = vmatprep.subr.bf16.mxu1 %v3520_v3  ;;  %v3624_v14 = vpack.c.bf16 %v40_v13, %v39_v12  ;;  %v3636_v17 = vpack.c.bf16 %v42_v16, %v41_v15  ;;  %v43_v18 = vld [vmem:[%s4386_s1 + $0x50] sm:$0xff]  ;;  %v44_v19 = vld [vmem:[%s4386_s1 + $0x58] sm:$0xff]  ;;  %v45_v21 = vld [vmem:[%s4386_s1 + $0x60] sm:$0xff] }
   0x6   :  { %2784 = vmatprep.mubr.msk.f32.mxu0 %vm66_vm0, %v53_v9  ;;  %2806 = vmatprep.mubr.msk.f32.mxu1 %vm66_vm0, %v2792_v11  ;;  %v3648_v20 = vpack.c.bf16 %v44_v19, %v43_v18  ;;  %v46_v22 = vld [vmem:[%s4386_s1 + $0x68] sm:$0xff]  ;;  %v47_v24 = vld [vmem:[%s4386_s1 + $0x70] sm:$0xff]  ;;  %v48_v25 = vld [vmem:[%s4386_s1 + $0x78] sm:$0xff] }
   0x7   :  { %v3660_v23 = vpack.c.bf16 %v46_v22, %v45_v21 }
   0x8   :  { %3278 = vmatpush1.bf16.msra.mxu0 %v3592_v6  ;;  %3305 = vmatpush1.bf16.msra.mxu1 %v3592_v6 }
   0x9   :  { %3279 = vmatprep.subr.bf16.mxu0 %v3520_v3  ;;  %3306 = vmatprep.subr.bf16.mxu1 %v3520_v3 }
   0xc   :  { %3281 = vmatpush1.bf16.msra.mxu0 %v3607_v10  ;;  %3308 = vmatpush1.bf16.msra.mxu1 %v3607_v10 }
   0xd   :  { %3282 = vmatprep.subr.bf16.mxu0 %v3520_v3  ;;  %3309 = vmatprep.subr.bf16.mxu1 %v3520_v3 }
  0x10   :  { %3284 = vmatpush1.bf16.msra.mxu0 %v3624_v14  ;;  %3311 = vmatpush1.bf16.msra.mxu1 %v3624_v14 }
  0x11   :  { %3285 = vmatprep.subr.bf16.mxu0 %v3520_v3  ;;  %3312 = vmatprep.subr.bf16.mxu1 %v3520_v3 }
  0x14   :  { %3287 = vmatpush1.bf16.msra.mxu0 %v3636_v17  ;;  %3314 = vmatpush1.bf16.msra.mxu1 %v3636_v17 }
  0x15   :  { %3288 = vmatprep.subr.bf16.mxu0 %v3520_v3  ;;  %3315 = vmatprep.subr.bf16.mxu1 %v3520_v3 }
  0x18   :  { %3290 = vmatpush1.bf16.msra.mxu0 %v3648_v20  ;;  %3317 = vmatpush1.bf16.msra.mxu1 %v3648_v20 }
  0x19   :  { %3291 = vmatprep.subr.bf16.mxu0 %v3520_v3  ;;  %3318 = vmatprep.subr.bf16.mxu1 %v3520_v3 }
  0x1a   :  { %14 = vsyncpa [#allocation3], 0  ;;  %v3672_v26 = vpack.c.bf16 %v48_v25, %v47_v24  ;;  %v49_v27 = vld [vmem:[%s4386_s1 + $0x80] sm:$0xff]  ;;  %v50_v28 = vld [vmem:[%s4386_s1 + $0x88] sm:$0xff]  ;;  %v3521_v30 = vmov 0.0   ;;  %vm88_vm1 = vcmask 1045504  }
  0x1b   :  { %v3684_v29 = vpack.c.bf16 %v50_v28, %v49_v27  ;;  %v3694_v31 = vld [vmem:[%s4386_s1 + $0x90] sm:$0x3f]  ;;  %v52_v32 = vld [vmem:[%s4385_s0] sm:$0xff]  ;;  %v55_v34 = vld [vmem:[%s4385_s0 + $0x18] sm:$0xff]  ;;  %vm3522_vm2 = vmmov 0   ;;  %vm649_vm3 = vcmask 130048  }
  0x1c   :  { %3293 = vmatpush1.bf16.msra.mxu0 %v3660_v23  ;;  %3320 = vmatpush1.bf16.msra.mxu1 %v3660_v23  ;;  %v2791_v33 = vld [vmem:[%s4385_s0 + $0x70] sm:$0xff]  ;;  %v2794_v36 = vld [vmem:[%s4385_s0 + $0x88] sm:$0xff]  ;;  %v2793_v37 = vld [vmem:[%s4385_s0 + $0x80] sm:$0xff]  ;;  %vm2596_vm4 = vcmask 982016   ;;  %vm2693_vm5 = vcmask 1043456   ;;  %vm2689_vm6 = vcmask 687104  }
  0x1d   :  { %3294 = vmatprep.subr.bf16.mxu0 %v3520_v3  ;;  %3321 = vmatprep.subr.bf16.mxu1 %v3520_v3  ;;  %v54_v35 = vld [vmem:[%s4385_s0 + $0x10] sm:$0xff]  ;;  %v57_v38 = vld [vmem:[%s4385_s0 + $0x28] sm:$0xff]  ;;  %v56_v39 = vld [vmem:[%s4385_s0 + $0x20] sm:$0xff]  ;;  %s3523_s16 = smov [#allocation2]   ;;  %vm2767_vm7 = vcmask 74752  }
  0x1e   :  { %v2796_v40 = vld [vmem:[%s4385_s0 + $0x98] sm:$0xff]  ;;  %v2795_v41 = vld [vmem:[%s4385_s0 + $0x90] sm:$0xff]  ;;  %v2798_v44 = vld [vmem:[%s4385_s0 + $0xa8] sm:$0xff]  ;;  %s2775_s17 = sshll.u32 %s3523_s16, 4  ;;  %s2776_s17 = int_to_ptr.vmem [resolvable:$true] %s2775_s17 }
  0x1f   :  { %v59_v42 = vld [vmem:[%s4385_s0 + $0x38] sm:$0xff]  ;;  %v58_v43 = vld [vmem:[%s4385_s0 + $0x30] sm:$0xff]  ;;  %v2797_v45 = vld [vmem:[%s4385_s0 + $0xa0] sm:$0xff]  ;;  %p3501_p1 = scmp.lt.s32.totalorder %s2776_s17, %s2776_s17 }
  0x20   :  { %3296 = vmatpush1.bf16.msra.mxu0 %v3672_v26  ;;  %3323 = vmatpush1.bf16.msra.mxu1 %v3672_v26  ;;  %v61_v46 = vld [vmem:[%s4385_s0 + $0x48] sm:$0xff]  ;;  %v60_v47 = vld [vmem:[%s4385_s0 + $0x40] sm:$0xff]  ;;  %v2800_v48 = vld [vmem:[%s4385_s0 + $0xb8] sm:$0xff] }
  0x21   :  { %3297 = vmatprep.subr.bf16.mxu0 %v3520_v3  ;;  %3324 = vmatprep.subr.bf16.mxu1 %v3520_v3  ;;  %v2799_v49 = vld [vmem:[%s4385_s0 + $0xb0] sm:$0xff]  ;;  %v63_v50 = vld [vmem:[%s4385_s0 + $0x58] sm:$0xff]  ;;  %v2802_v52 = vld [vmem:[%s4385_s0 + $0xc8] sm:$0xff] }
  0x22   :  { %v62_v51 = vld [vmem:[%s4385_s0 + $0x50] sm:$0xff]  ;;  %v2801_v53 = vld [vmem:[%s4385_s0 + $0xc0] sm:$0xff]  ;;  %v65_v54 = vld [vmem:[%s4385_s0 + $0x68] sm:$0x3] }
  0x23   :  { %v64_v55 = vld [vmem:[%s4385_s0 + $0x60] sm:$0x3]  ;;  %v2804_v56 = vld [vmem:[%s4385_s0 + $0xd8] sm:$0x3]  ;;  %v2803_v57 = vld [vmem:[%s4385_s0 + $0xd0] sm:$0x3] }
  0x24   :  { %3299 = vmatpush1.bf16.msra.mxu0 %v3684_v29  ;;  %3326 = vmatpush1.bf16.msra.mxu1 %v3684_v29  ;;  %v2814_v58 = vld [vmem:[%s4385_s0 + $0xe8] sm:$0xff]  ;;  %v2836_v59 = vld [vmem:[%s4385_s0 + $0x158] sm:$0xff]  ;;  %v2813_v60 = vld [vmem:[%s4385_s0 + $0xe0] sm:$0xff] }
  0x25   :  { %128 = vmatprep.subr.mxu0 %v3521_v30  ;;  %264 = vmatprep.subr.mxu1 %v3521_v30  ;;  %v2816_v61 = vld [vmem:[%s4385_s0 + $0xf8] sm:$0xff]  ;;  %v2835_v62 = vld [vmem:[%s4385_s0 + $0x150] sm:$0xff]  ;;  %v2838_v63 = vld [vmem:[%s4385_s0 + $0x168] sm:$0xff] }
  0x26   :  { %v2815_v0 = vld [vmem:[%s4385_s0 + $0xf0] sm:$0xff]  ;;  %v2818_v1 = vld [vmem:[%s4385_s0 + $0x108] sm:$0xff]  ;;  %v2837_v2 = vld [vmem:[%s4385_s0 + $0x160] sm:$0xff] }
  0x27   :  { %v2817_v5 = vld [vmem:[%s4385_s0 + $0x100] sm:$0xff]  ;;  %v2839_v7 = vld [vmem:[%s4385_s0 + $0x170] sm:$0xff]  ;;  %v2842_v8 = vld [vmem:[%s4385_s0 + $0x188] sm:$0xff] }
  0x28   :  { %2783 = vmatpush1.msk.msra.mxu0 %vm88_vm1, %v3694_v31  ;;  %2805 = vmatpush1.msk.msra.mxu1 %vm88_vm1, %v3694_v31  ;;  %v2819_v9 = vld [vmem:[%s4385_s0 + $0x110] sm:$0xff]  ;;  %v2841_v11 = vld [vmem:[%s4385_s0 + $0x180] sm:$0xff]  ;;  %v2844_v12 = vld [vmem:[%s4385_s0 + $0x198] sm:$0xff] }
  0x29   :  { %157 = vmatmul.mubr.f32.vlgmr.msra.gmra.mrb[0].mxu0 %v52_v32  ;;  %3327 = vmatprep.subr.bf16.mxu0 %v3520_v3  ;;  %v2821_v13 = vld [vmem:[%s4385_s0 + $0x120] sm:$0xff]  ;;  %v2843_v15 = vld [vmem:[%s4385_s0 + $0x190] sm:$0xff]  ;;  %v2846_v16 = vld [vmem:[%s4385_s0 + $0x1a8] sm:$0xff] }
  0x2a   :  { %293 = vmatmul.mubr.f32.vlgmr.msra.gmra.mrb[0].mxu1 %v2791_v33  ;;  %3329 = vmatpush1.bf16.msra.mxu0 %v3584_v4  ;;  %v2826_v18 = vld [vmem:[%s4385_s0 + $0x148] sm:$0x3]  ;;  %v2845_v19 = vld [vmem:[%s4385_s0 + $0x1a0] sm:$0xff]  ;;  %v2847_v22 = vld [vmem:[%s4385_s0 + $0x1b0] sm:$0x3] }
  0x2b   :  { %3354 = vmatprep.subr.bf16.mxu1 %v3520_v3  ;;  %3330 = vmatprep.subr.bf16.mxu0 %v3520_v3  ;;  %v2825_v21 = vld [vmem:[%s4385_s0 + $0x140] sm:$0x3]  ;;  %v2859_v24 = vld [vmem:[%s4388_s3 + $0x18] sm:$0xff]  ;;  %v643_v27 = vld [vmem:[%s4388_s3 + $0x8] sm:$0xff] }
  0x2c   :  { %3356 = vmatpush1.bf16.msra.mxu1 %v3584_v4  ;;  %2785 = vmatprep.mubr.msk.f32.mxu0 %vm66_vm0, %v55_v34  ;;  %v2840_v4 = vld [vmem:[%s4385_s0 + $0x178] sm:$0xff] }
  0x2d   :  { %3357 = vmatprep.subr.bf16.mxu1 %v3520_v3  ;;  %162 = vmatmul.mubr.f32.gmra.mrb[2].mxu0 %v54_v35 }
  0x2e   :  { %3332 = vmatpush1.bf16.msra.mxu0 %v3592_v6  ;;  %2807 = vmatprep.mubr.msk.f32.mxu1 %vm66_vm0, %v2794_v36 }
  0x2f   :  { %3333 = vmatprep.subr.bf16.mxu0 %v3520_v3  ;;  %298 = vmatmul.mubr.f32.gmra.mrb[2].mxu1 %v2793_v37 }
  0x30   :  { %3359 = vmatpush1.bf16.msra.mxu1 %v3592_v6  ;;  %2786 = vmatprep.mubr.msk.f32.mxu0 %vm66_vm0, %v57_v38  ;;  %v2820_v6 = vld [vmem:[%s4385_s0 + $0x118] sm:$0xff] }
  0x31   :  { %3360 = vmatprep.subr.bf16.mxu1 %v3520_v3  ;;  %167 = vmatmul.mubr.f32.gmra.mrb[4].mxu0 %v56_v39 }
  0x32   :  { %3335 = vmatpush1.bf16.msra.mxu0 %v3607_v10  ;;  %2808 = vmatprep.mubr.msk.f32.mxu1 %vm66_vm0, %v2796_v40 }
  0x33   :  { %3336 = vmatprep.subr.bf16.mxu0 %v3520_v3  ;;  %303 = vmatmul.mubr.f32.gmra.mrb[4].mxu1 %v2795_v41 }
  0x34   :  { %3362 = vmatpush1.bf16.msra.mxu1 %v3607_v10  ;;  %2787 = vmatprep.mubr.msk.f32.mxu0 %vm66_vm0, %v59_v42  ;;  %v2822_v10 = vld [vmem:[%s4385_s0 + $0x128] sm:$0xff] }
  0x35   :  { %3363 = vmatprep.subr.bf16.mxu1 %v3520_v3  ;;  %172 = vmatmul.mubr.f32.gmra.mrb[6].mxu0 %v58_v43 }
  0x36   :  { %3338 = vmatpush1.bf16.msra.mxu0 %v3624_v14  ;;  %2809 = vmatprep.mubr.msk.f32.mxu1 %vm66_vm0, %v2798_v44 }
  0x37   :  { %3339 = vmatprep.subr.bf16.mxu0 %v3520_v3  ;;  %308 = vmatmul.mubr.f32.gmra.mrb[6].mxu1 %v2797_v45 }
  0x38   :  { %3365 = vmatpush1.bf16.msra.mxu1 %v3624_v14  ;;  %2788 = vmatprep.mubr.msk.f32.mxu0 %vm66_vm0, %v61_v46  ;;  %v2824_v14 = vld [vmem:[%s4385_s0 + $0x138] sm:$0xff] }
  0x39   :  { %3366 = vmatprep.subr.bf16.mxu1 %v3520_v3  ;;  %177 = vmatmul.mubr.f32.gmra.mrb[8].mxu0 %v60_v47 }
  0x3a   :  { %3341 = vmatpush1.bf16.msra.mxu0 %v3636_v17  ;;  %2810 = vmatprep.mubr.msk.f32.mxu1 %vm66_vm0, %v2800_v48 }
  0x3b   :  { %3342 = vmatprep.subr.bf16.mxu0 %v3520_v3  ;;  %313 = vmatmul.mubr.f32.gmra.mrb[8].mxu1 %v2799_v49 }
  0x3c   :  { %3368 = vmatpush1.bf16.msra.mxu1 %v3636_v17  ;;  %2789 = vmatprep.mubr.msk.f32.mxu0 %vm66_vm0, %v63_v50  ;;  %v2823_v17 = vld [vmem:[%s4385_s0 + $0x130] sm:$0xff] }
  0x3d   :  { %3369 = vmatprep.subr.bf16.mxu1 %v3520_v3  ;;  %182 = vmatmul.mubr.f32.gmra.mrb[10].mxu0 %v62_v51 }
  0x3e   :  { %3344 = vmatpush1.bf16.msra.mxu0 %v3648_v20  ;;  %2811 = vmatprep.mubr.msk.f32.mxu1 %vm66_vm0, %v2802_v52 }
  0x3f   :  { %3345 = vmatprep.subr.bf16.mxu0 %v3520_v3  ;;  %318 = vmatmul.mubr.f32.gmra.mrb[10].mxu1 %v2801_v53 }
  0x40   :  { %3371 = vmatpush1.bf16.msra.mxu1 %v3648_v20  ;;  %2790 = vmatprep.mubr.msk.f32.mxu0 %vm66_vm0, %v65_v54  ;;  %v2848_v20 = vld [vmem:[%s4385_s0 + $0x1b8] sm:$0x3] }
  0x41   :  { %3372 = vmatprep.subr.bf16.mxu1 %v3520_v3  ;;  %187 = vmatmul.mubr.f32.gmra.mrb[12].mxu0 %v64_v55 }
  0x42   :  { %3347 = vmatpush1.bf16.msra.mxu0 %v3660_v23  ;;  %2812 = vmatprep.mubr.msk.f32.mxu1 %vm66_vm0, %v2804_v56 }
  0x43   :  { %3348 = vmatprep.subr.bf16.mxu0 %v3520_v3  ;;  %323 = vmatmul.mubr.f32.gmra.mrb[12].mxu1 %v2803_v57 }
  0x44   :  { %3374 = vmatpush1.bf16.msra.mxu1 %v3660_v23  ;;  %2828 = vmatprep.mubr.msk.f32.mxu0 %vm66_vm0, %v2814_v58  ;;  %v2858_v23 = vld [vmem:[%s4388_s3 + $0x10] sm:$0xff] }
  0x45   :  { %3375 = vmatprep.subr.bf16.mxu1 %v3520_v3  ;;  %2850 = vmatprep.mubr.msk.f32.mxu1 %vm66_vm0, %v2836_v59  ;;  %v3382_v25 = vpack.c.bf16 %v2859_v24, %v2858_v23  ;;  %v2872_v23 = vld [vmem:[%s4388_s3 + $0x58] sm:$0xff] }
  0x46   :  { %3350 = vmatpush1.bf16.msra.mxu0 %v3672_v26 }
  0x47   :  { %3351 = vmatprep.subr.bf16.mxu0 %v3520_v3 }
  0x48   :  { %3377 = vmatpush1.bf16.msra.mxu1 %v3672_v26  ;;  %v642_v26 = vld [vmem:[%s4388_s3] sm:$0xff] }
  0x49   :  { %3378 = vmatprep.subr.bf16.mxu1 %v3520_v3  ;;  %v3385_v28 = vpack.c.bf16 %v643_v27, %v642_v26 }
  0x4a   :  { %3353 = vmatpush1.bf16.msra.mxu0 %v3684_v29 }
  0x4b   :  { %407 = vmatprep.subr.mxu0 %v3521_v30 }
  0x4c   :  { %3380 = vmatpush1.bf16.msra.mxu1 %v3684_v29 }
  0x4d   :  { %550 = vmatprep.subr.mxu1 %v3521_v30 }
  0x4e   :  { %2827 = vmatpush1.msk.msra.mxu0 %vm88_vm1, %v3694_v31 }
  0x4f   :  { %436 = vmatmul.mubr.f32.vlgmr.msra.gmra.mrb[14].mxu0 %v2813_v60  ;;  %3381 = vmatprep.subr.bf16.mxu0 %v3520_v3 }
  0x50   :  { %2849 = vmatpush1.msk.msra.mxu1 %vm88_vm1, %v3694_v31  ;;  %2829 = vmatprep.mubr.msk.f32.mxu0 %vm66_vm0, %v2816_v61 }
  0x51   :  { %579 = vmatmul.mubr.f32.vlgmr.msra.gmra.mrb[14].mxu1 %v2835_v62  ;;  %3384 = vmatprep.subr.bf16.mxu1 %v3520_v3 }
  0x52   :  { %2851 = vmatprep.mubr.msk.f32.mxu1 %vm66_vm0, %v2838_v63  ;;  %3383 = vmatpush3.bf16.msra.mxu0 %v3382_v25 }
  0x53   :  { %441 = vmatmul.mubr.f32.gmra.mrb[16].mxu0 %v2815_v0  ;;  %3387 = vmatprep.subr.bf16.mxu0 %v3520_v3 }
  0x54   :  { %2830 = vmatprep.mubr.msk.f32.mxu0 %vm66_vm0, %v2818_v1  ;;  %3386 = vmatpush3.bf16.msra.mxu1 %v3385_v28 }
  0x55   :  { %584 = vmatmul.mubr.f32.gmra.mrb[16].mxu1 %v2837_v2  ;;  %3390 = vmatprep.subr.bf16.mxu1 %v3520_v3 }
  0x56   :  { %2852 = vmatprep.mubr.msk.f32.mxu1 %vm66_vm0, %v2840_v4 }
  0x57   :  { %446 = vmatmul.mubr.f32.gmra.mrb[18].mxu0 %v2817_v5 }
  0x58   :  { %2831 = vmatprep.mubr.msk.f32.mxu0 %vm66_vm0, %v2820_v6  ;;  %v3978_v6 = vld [vmem:[%s4387_s2] ss:$0 sm:$0xff] }
  0x59   :  { %589 = vmatmul.mubr.f32.gmra.mrb[18].mxu1 %v2839_v7 }
  0x5a   :  { %2853 = vmatprep.mubr.msk.f32.mxu1 %vm66_vm0, %v2842_v8 }
  0x5b   :  { %451 = vmatmul.mubr.f32.gmra.mrb[20].mxu0 %v2819_v9  ;;  %v2865_v9 = vld [vmem:[%s4388_s3 + $0x30] sm:$0xff] }
  0x5c   :  { %2832 = vmatprep.mubr.msk.f32.mxu0 %vm66_vm0, %v2822_v10  ;;  %v2866_v10 = vld [vmem:[%s4388_s3 + $0x38] sm:$0xff] }
  0x5d   :  { %594 = vmatmul.mubr.f32.gmra.mrb[20].mxu1 %v2841_v11 }
  0x5e   :  { %2854 = vmatprep.mubr.msk.f32.mxu1 %vm66_vm0, %v2844_v12 }
  0x5f   :  { %456 = vmatmul.mubr.f32.gmra.mrb[22].mxu0 %v2821_v13 }
  0x60   :  { %2833 = vmatprep.mubr.msk.f32.mxu0 %vm66_vm0, %v2824_v14 }
  0x61   :  { %599 = vmatmul.mubr.f32.gmra.mrb[22].mxu1 %v2843_v15  ;;  %v2862_v15 = vld [vmem:[%s4388_s3 + $0x20] sm:$0xff] }
  0x62   :  { %2855 = vmatprep.mubr.msk.f32.mxu1 %vm66_vm0, %v2846_v16  ;;  %v2863_v16 = vld [vmem:[%s4388_s3 + $0x28] sm:$0xff] }
  0x63   :  { %461 = vmatmul.mubr.f32.gmra.mrb[24].mxu0 %v2823_v17  ;;  %v3388_v25 = vpack.c.bf16 %v2863_v16, %v2862_v15 }
  0x64   :  { %2834 = vmatprep.mubr.msk.f32.mxu0 %vm66_vm0, %v2826_v18  ;;  %v3391_v18 = vpack.c.bf16 %v2866_v10, %v2865_v9 }
  0x65   :  { %604 = vmatmul.mubr.f32.gmra.mrb[24].mxu1 %v2845_v19 }
  0x66   :  { %2856 = vmatprep.mubr.msk.f32.mxu1 %vm66_vm0, %v2848_v20 }
  0x67   :  { %466 = vmatmul.mubr.f32.gmra.mrb[26].mxu0 %v2825_v21 }
  0x68   :  { %3044 = vmatprep.mubr.msk.f32.mxu0 %vm3522_vm2, %v3521_v30 }
  0x69   :  { %609 = vmatmul.mubr.f32.gmra.mrb[26].mxu1 %v2847_v22  ;;  %v2871_v22 = vld [vmem:[%s4388_s3 + $0x50] sm:$0xff] }
  0x6a   :  { %3051 = vmatprep.mubr.msk.f32.mxu1 %vm3522_vm2, %v3521_v30 }
  0xfc   :  { %v158_v29 = vpop.f32.mrb[0].mxu0 }
  0xfd   :  { %v160_v31 = vpop.f32.mrb[1].mxu0  ;;  %v294_v32 = vpop.f32.mrb[0].mxu1 }
  0xfe   :  { %v328_v33 = vmax.f32 %v158_v29, %v294_v32  ;;  %v296_v34 = vpop.f32.mrb[1].mxu1  ;;  %v2868_v29 = vld [vmem:[%s4388_s3 + $0x40] sm:$0xff]  ;;  %v2869_v31 = vld [vmem:[%s4388_s3 + $0x48] sm:$0xff] }
  0xff   :  { %v3397_v34 = vpack.c.bf16 %v2872_v23, %v2871_v22 }
 0x100   :  { %v163_v35 = vpop.f32.mrb[2].mxu0 }
 0x101   :  { %v165_v36 = vpop.f32.mrb[3].mxu0 }
 0x102   :  { %v299_v37 = vpop.f32.mrb[2].mxu1 }
 0x103   :  { %v329_v38 = vmax.f32 %v163_v35, %v299_v37  ;;  %v301_v39 = vpop.f32.mrb[3].mxu1 }
 0x104   :  { %v168_v40 = vpop.f32.mrb[4].mxu0  ;;  %v2878_v39 = vld [vmem:[%s4388_s3 + $0x78] sm:$0xff] }
 0x105   :  { %v170_v41 = vpop.f32.mrb[5].mxu0 }
 0x106   :  { %v304_v42 = vpop.f32.mrb[4].mxu1 }
 0x107   :  { %v330_v43 = vmax.f32 %v168_v40, %v304_v42  ;;  %v306_v44 = vpop.f32.mrb[5].mxu1  ;;  %v3394_v42 = vpack.c.bf16 %v2869_v31, %v2868_v29  ;;  %v2892_v29 = vld [vmem:[%s4388_s3 + $0xc0] sm:$0xff]  ;;  %v2893_v31 = vld [vmem:[%s4388_s3 + $0xc8] sm:$0xff] }
 0x108   :  { %v3951_v45 = vpop.f32.mrb[6].mxu0 }
 0x109   :  { %v175_v46 = vpop.f32.mrb[7].mxu0 }
 0x10a   :  { %v3953_v47 = vpop.f32.mrb[6].mxu1 }
 0x10b   :  { %v331_v48 = vmax.f32 %v3951_v45, %v3953_v47  ;;  %v311_v49 = vpop.f32.mrb[7].mxu1 }
 0x10c   :  { %v3957_v50 = vpop.f32.mrb[8].mxu0  ;;  %v2874_v49 = vld [vmem:[%s4388_s3 + $0x60] sm:$0xff] }
 0x10d   :  { %v180_v51 = vpop.f32.mrb[9].mxu0 }
 0x10e   :  { %v3959_v52 = vpop.f32.mrb[8].mxu1  ;;  %v2875_v51 = vld [vmem:[%s4388_s3 + $0x68] sm:$0xff] }
 0x10f   :  { %v332_v53 = vmax.f32 %v3957_v50, %v3959_v52  ;;  %v316_v54 = vpop.f32.mrb[9].mxu1 }
 0x110   :  { %v3963_v55 = vpop.f32.mrb[10].mxu0 }
 0x111   :  { %v185_v56 = vpop.f32.mrb[11].mxu0 }
 0x112   :  { %v3965_v57 = vpop.f32.mrb[10].mxu1 }
 0x113   :  { %v333_v58 = vmax.f32 %v3963_v55, %v3965_v57  ;;  %v321_v59 = vpop.f32.mrb[11].mxu1  ;;  %v2895_v55 = vld [vmem:[%s4388_s3 + $0xd0] sm:$0xff]  ;;  %v2896_v57 = vld [vmem:[%s4388_s3 + $0xd8] sm:$0xff] }
 0x114   :  { %v3969_v60 = vpop.f32.mrb[12].mxu0 }
 0x115   :  { %v190_v61 = vpop.f32.mrb[13].mxu0 }
 0x116   :  { %v3971_v62 = vpop.f32.mrb[12].mxu1  ;;  %v2883_v61 = vld [vmem:[%s4388_s3 + $0x90] sm:$0xff] }
 0x117   :  { %v334_v63 = vmax.f32 %v3969_v60, %v3971_v62  ;;  %v326_v0 = vpop.f32.mrb[13].mxu1  ;;  %v3421_v60 = vpack.c.bf16 %v2896_v57, %v2895_v55 }
 0x118   :  { %v2884_v0 = vld [vmem:[%s4388_s3 + $0x98] sm:$0xff] }
 0x119   :  { %v3409_v50 = vpack.c.bf16 %v2884_v0, %v2883_v61  ;;  %v2914_v61 = vld [vmem:[%s4388_s3 + $0x138] sm:$0xff] }
 0x122   :  { %v437_v1 = vpop.f32.mrb[14].mxu0 }
 0x123   :  { %v471_v2 = vmax.f32 %v328_v33, %v437_v1  ;;  %v439_v4 = vpop.f32.mrb[15].mxu0 }
 0x124   :  { %v580_v5 = vpop.f32.mrb[14].mxu1 }
 0x125   :  { %v614_v7 = vmax.f32 %v471_v2, %v580_v5  ;;  %v582_v8 = vpop.f32.mrb[15].mxu1  ;;  %v3400_v2 = vpack.c.bf16 %v2875_v51, %v2874_v49  ;;  %v2908_v49 = vld [vmem:[%s4388_s3 + $0x118] sm:$0xff] }
 0x126   :  { %v442_v11 = vpop.f32.mrb[16].mxu0  ;;  %v2881_v8 = vld [vmem:[%s4388_s3 + $0x88] sm:$0xff] }
 0x127   :  { %v628_v12 = vadd.f32 %v3978_v6, %v614_v7  ;;  %v472_v13 = vmax.f32 %v329_v38, %v442_v11  ;;  %v444_v14 = vpop.f32.mrb[17].mxu0  ;;  %v2877_v38 = vld [vmem:[%s4388_s3 + $0x70] sm:$0xff]  ;;  %v2880_v7 = vld [vmem:[%s4388_s3 + $0x80] sm:$0xff] }
 0x128   :  { %v585_v17 = vpop.f32.mrb[16].mxu1  ;;  %v3403_v45 = vpack.c.bf16 %v2878_v39, %v2877_v38  ;;  %v3406_v15 = vpack.c.bf16 %v2881_v8, %v2880_v7  ;;  %v3418_v38 = vpack.c.bf16 %v2893_v31, %v2892_v29  ;;  %v2576_v29 = vld [vmem:[%s4390_s5 + $0x10] sm:$0xff]  ;;  %v2577_v31 = vld [vmem:[%s4390_s5 + $0x18] sm:$0xff] }
 0x129   :  { %v635_v19 = vmax.f32 %v628_v12, 0.0  ;;  %v615_v20 = vmax.f32 %v472_v13, %v585_v17  ;;  %v587_v21 = vpop.f32.mrb[17].mxu1  ;;  %v2889_v12 = vld [vmem:[%s4388_s3 + $0xb0] sm:$0xff]  ;;  %v2890_v13 = vld [vmem:[%s4388_s3 + $0xb8] sm:$0xff] }
 0x12a   :  { %v447_v24 = vpop.f32.mrb[18].mxu0  ;;  %v3415_v22 = vpack.c.bf16 %v2890_v13, %v2889_v12 }
 0x12b   :  { %v648_v26 = vrot.slane %v635_v19, 2  ;;  %v629_v27 = vadd.f32 %v3978_v6, %v615_v20  ;;  %3052 = vmatmul.mubr.msk.f32.vlgmr.msra.gmra.mrb[28].mxu1 %vm649_vm3, %v635_v19  ;;  %v449_v28 = vpop.f32.mrb[19].mxu0  ;;  %v473_v32 = vmax.f32 %v330_v43, %v447_v24  ;;  %v874_v35 = vrot.slane %v635_v19, 6 }
 0x12c   :  { %v590_v33 = vpop.f32.mrb[18].mxu1  ;;  %3392 = vmatpush3.bf16.msra.mxu1 %v3391_v18  ;;  %3065 = vmatprep.mubr.msk.f32.mxu1 %vm3522_vm2, %v3521_v30  ;;  %v797_v43 = vrot.slane %v635_v19, 4  ;;  %v2886_v18 = vld [vmem:[%s4388_s3 + $0xa0] sm:$0xff]  ;;  %v2887_v19 = vld [vmem:[%s4388_s3 + $0xa8] sm:$0xff] }
 0x12d   :  { %v4009_v36 = vmax.f32 %v629_v27, 0.0  ;;  %3045 = vmatmul.mubr.msk.f32.vlgmr.msra.gmra.mrb[28].mxu0 %vm649_vm3, %v648_v26  ;;  %v592_v37 = vpop.f32.mrb[19].mxu1  ;;  %3396 = vmatprep.subr.bf16.mxu1 %v3520_v3  ;;  %v616_v40 = vmax.f32 %v473_v32, %v590_v33  ;;  %v3412_v27 = vpack.c.bf16 %v2887_v19, %v2886_v18  ;;  %v2922_v18 = vld [vmem:[%s4388_s3 + $0x160] sm:$0xff]  ;;  %v2923_v19 = vld [vmem:[%s4388_s3 + $0x168] sm:$0xff] }
 0x12e   :  { %v452_v41 = vpop.f32.mrb[20].mxu0  ;;  %3389 = vmatpush3.bf16.msra.mxu0 %v3388_v25  ;;  %3058 = vmatprep.mubr.msk.f32.mxu0 %vm3522_vm2, %v3521_v30 }
 0x12f   :  { %v474_v44 = vmax.f32 %v331_v48, %v452_v41  ;;  %3066 = vmatmul.mubr.msk.f32.vlgmr.msra.gmra.mrb[30].mxu1 %vm649_vm3, %v874_v35  ;;  %v454_v46 = vpop.f32.mrb[21].mxu0  ;;  %3393 = vmatprep.subr.bf16.mxu0 %v3520_v3  ;;  %v1028_v47 = vrot.slane %v4009_v36, 2  ;;  %v630_v48 = vadd.f32 %v3978_v6, %v616_v40  ;;  %v1182_v52 = vrot.slane %v4009_v36, 6  ;;  %v2901_v35 = vld [vmem:[%s4388_s3 + $0xf0] sm:$0xff]  ;;  %v2898_v40 = vld [vmem:[%s4388_s3 + $0xe0] sm:$0xff]  ;;  %v2899_v41 = vld [vmem:[%s4388_s3 + $0xe8] sm:$0xff] }
 0x130   :  { %v595_v54 = vpop.f32.mrb[20].mxu1  ;;  %3398 = vmatpush3.bf16.msra.mxu1 %v3397_v34  ;;  %3079 = vmatprep.mubr.msk.f32.mxu1 %vm3522_vm2, %v3521_v30  ;;  %v1105_v16 = vrot.slane %v4009_v36, 4  ;;  %v2907_v46 = vld [vmem:[%s4388_s3 + $0x110] sm:$0xff]  ;;  %v3424_v51 = vpack.c.bf16 %v2899_v41, %v2898_v40  ;;  %v2585_v40 = vld [vmem:[%s4390_s5 + $0x58] sm:$0xff] }
 0x131   :  { %v617_v56 = vmax.f32 %v474_v44, %v595_v54  ;;  %3059 = vmatmul.mubr.msk.f32.vlgmr.msra.gmra.mrb[30].mxu0 %vm649_vm3, %v797_v43  ;;  %v597_v59 = vpop.f32.mrb[21].mxu1  ;;  %3402 = vmatprep.subr.bf16.mxu1 %v3520_v3  ;;  %v2904_v54 = vld [vmem:[%s4388_s3 + $0x100] sm:$0xff] }
 0x132   :  { %v457_v1 = vpop.f32.mrb[22].mxu0  ;;  %3395 = vmatpush3.bf16.msra.mxu0 %v3394_v42  ;;  %3072 = vmatprep.mubr.msk.f32.mxu0 %vm3522_vm2, %v3521_v30  ;;  %v2913_v59 = vld [vmem:[%s4388_s3 + $0x130] sm:$0xff] }
 0x133   :  { %v4049_v4 = vmax.f32 %v332_v53, %v457_v1  ;;  %3080 = vmatmul.mubr.msk.f32.vlgmr.msra.gmra.mrb[32].mxu1 %vm649_vm3, %v1028_v47  ;;  %v459_v5 = vpop.f32.mrb[23].mxu0  ;;  %3399 = vmatprep.subr.bf16.mxu0 %v3520_v3  ;;  %v4064_v53 = vmax.f32 %v630_v48, 0.0  ;;  %v631_v24 = vadd.f32 %v3978_v6, %v617_v56  ;;  %v3433_v47 = vpack.c.bf16 %v2908_v49, %v2907_v46  ;;  %v2588_v46 = vld [vmem:[%s4390_s5 + $0x70] sm:$0xff]  ;;  %v2671_v49 = vld [vmem:[%s4392_s7] sm:$0xff] }
 0x134   :  { %v4059_v9 = vpop.f32.mrb[22].mxu1  ;;  %3404 = vmatpush3.bf16.msra.mxu1 %v3403_v45  ;;  %3093 = vmatprep.mubr.msk.f32.mxu1 %vm3522_vm2, %v3521_v30  ;;  %v2905_v45 = vld [vmem:[%s4388_s3 + $0x108] sm:$0xff]  ;;  %v3439_v5 = vpack.c.bf16 %v2914_v61, %v2913_v59 }
 0x135   :  { %v618_v10 = vmax.f32 %v4049_v4, %v4059_v9  ;;  %3073 = vmatmul.mubr.msk.f32.vlgmr.msra.gmra.mrb[32].mxu0 %vm649_vm3, %v4009_v36  ;;  %v602_v11 = vpop.f32.mrb[23].mxu1  ;;  %3408 = vmatprep.subr.bf16.mxu1 %v3520_v3  ;;  %v1336_v23 = vrot.slane %v4064_v53, 2  ;;  %v1490_v62 = vrot.slane %v4064_v53, 6  ;;  %v2902_v36 = vld [vmem:[%s4388_s3 + $0xf8] sm:$0xff]  ;;  %v1413_v39 = vrot.slane %v4064_v53, 4  ;;  %v2911_v4 = vld [vmem:[%s4388_s3 + $0x128] sm:$0xff] }
 0x136   :  { %v462_v14 = vpop.f32.mrb[24].mxu0  ;;  %3401 = vmatpush3.bf16.msra.mxu0 %v3400_v2  ;;  %3086 = vmatprep.mubr.msk.f32.mxu0 %vm3522_vm2, %v3521_v30  ;;  %v3427_v42 = vpack.c.bf16 %v2902_v36, %v2901_v35  ;;  %v3430_v0 = vpack.c.bf16 %v2905_v45, %v2904_v54  ;;  %v2910_v2 = vld [vmem:[%s4388_s3 + $0x120] sm:$0xff]  ;;  %v2919_v9 = vld [vmem:[%s4388_s3 + $0x150] sm:$0xff]  ;;  %v2676_v59 = vld [vmem:[%s4392_s7 + $0x28] sm:$0xff] }
 0x137   :  { %3094 = vmatmul.mubr.msk.f32.vlgmr.msra.gmra.mrb[34].mxu1 %vm649_vm3, %v1182_v52  ;;  %v464_v17 = vpop.f32.mrb[25].mxu0  ;;  %3405 = vmatprep.subr.bf16.mxu0 %v3520_v3  ;;  %v4091_v20 = vmax.f32 %v333_v58, %v462_v14  ;;  %v632_v44 = vadd.f32 %v3978_v6, %v618_v10  ;;  %v3436_v52 = vpack.c.bf16 %v2911_v4, %v2910_v2  ;;  %v2917_v10 = vld [vmem:[%s4388_s3 + $0x148] sm:$0xff]  ;;  %v2925_v14 = vld [vmem:[%s4388_s3 + $0x170] sm:$0xff]  ;;  %v2582_v36 = vld [vmem:[%s4390_s5 + $0x40] sm:$0xff] }
 0x138   :  { %v4093_v21 = vpop.f32.mrb[24].mxu1  ;;  %3410 = vmatpush3.bf16.msra.mxu1 %v3409_v50  ;;  %3107 = vmatprep.mubr.msk.f32.mxu1 %vm3522_vm2, %v3521_v30  ;;  %v2920_v50 = vld [vmem:[%s4388_s3 + $0x158] sm:$0xff]  ;;  %v2673_v54 = vld [vmem:[%s4392_s7 + $0x10] sm:$0xff] }
 0x139   :  { %3087 = vmatmul.mubr.msk.f32.vlgmr.msra.gmra.mrb[34].mxu0 %vm649_vm3, %v1105_v16  ;;  %v607_v25 = vpop.f32.mrb[25].mxu1  ;;  %3414 = vmatprep.subr.bf16.mxu1 %v3520_v3  ;;  %v619_v58 = vmax.f32 %v4091_v20, %v4093_v21  ;;  %v639_v56 = vmax.f32 %v632_v44, 0.0  ;;  %v3445_v11 = vpack.c.bf16 %v2920_v50, %v2919_v9 }
 0x13a   :  { %v467_v26 = vpop.f32.mrb[26].mxu0  ;;  %3407 = vmatpush3.bf16.msra.mxu0 %v3406_v15  ;;  %3100 = vmatprep.mubr.msk.f32.mxu0 %vm3522_vm2, %v3521_v30  ;;  %v2926_v15 = vld [vmem:[%s4388_s3 + $0x178] sm:$0xff] }
 0x13b   :  { %v4114_v28 = vmax.f32 %v334_v63, %v467_v26  ;;  %3108 = vmatmul.mubr.msk.f32.vlgmr.msra.gmra.mrb[36].mxu1 %vm649_vm3, %v1336_v23  ;;  %3411 = vmatprep.subr.bf16.mxu0 %v3520_v3  ;;  %v469_v32 = vpop.f32.mrb[27].mxu0  ;;  %v638_v63 = vmax.f32 %v631_v24, 0.0  ;;  %v1952_v7 = vrot.slane %v639_v56, 2  ;;  %v633_v8 = vadd.f32 %v3978_v6, %v619_v58  ;;  %v2928_v23 = vld [vmem:[%s4388_s3 + $0x180] sm:$0xff]  ;;  %v2929_v24 = vld [vmem:[%s4388_s3 + $0x188] sm:$0xff] }
 0x13c   :  { %v4124_v33 = vpop.f32.mrb[26].mxu1  ;;  %3416 = vmatpush3.bf16.msra.mxu1 %v3415_v22  ;;  %3121 = vmatprep.mubr.msk.f32.mxu1 %vm3522_vm2, %v3521_v30  ;;  %v2106_v12 = vrot.slane %v639_v56, 6  ;;  %v2029_v17 = vrot.slane %v639_v56, 4  ;;  %v3451_v20 = vpack.c.bf16 %v2926_v15, %v2925_v14  ;;  %v3448_v22 = vpack.c.bf16 %v2923_v19, %v2922_v18 }
 0x13d   :  { %v620_v34 = vmax.f32 %v4114_v28, %v4124_v33  ;;  %3101 = vmatmul.mubr.msk.f32.vlgmr.msra.gmra.mrb[36].mxu0 %vm649_vm3, %v4064_v53  ;;  %3420 = vmatprep.subr.bf16.mxu1 %v3520_v3  ;;  %v612_v37 = vpop.f32.mrb[27].mxu1  ;;  %v1644_v43 = vrot.slane %v638_v63, 2  ;;  %v1798_v48 = vrot.slane %v638_v63, 6  ;;  %v1721_v1 = vrot.slane %v638_v63, 4  ;;  %v2916_v53 = vld [vmem:[%s4388_s3 + $0x140] sm:$0xff] }
 0x13e   :  { %3413 = vmatpush3.bf16.msra.mxu0 %v3412_v27  ;;  %3114 = vmatprep.mubr.msk.f32.mxu0 %vm3522_vm2, %v3521_v30  ;;  %v640_v13 = vmax.f32 %v633_v8, 0.0  ;;  %v3442_v16 = vpack.c.bf16 %v2917_v10, %v2916_v53  ;;  %v3454_v55 = vpack.c.bf16 %v2929_v24, %v2928_v23  ;;  %v2575_v27 = vld [vmem:[%s4390_s5 + $0x8] sm:$0xff]  ;;  %v3460_v32 = vpack.c.bf16 %v2577_v31, %v2576_v29  ;;  %v2578_v33 = vld [vmem:[%s4390_s5 + $0x20] sm:$0xff] }
 0x13f   :  { %3122 = vmatmul.mubr.msk.f32.vlgmr.msra.gmra.mrb[38].mxu1 %vm649_vm3, %v1490_v62  ;;  %3417 = vmatprep.subr.bf16.mxu0 %v3520_v3  ;;  %v634_v58 = vadd.f32 %v3978_v6, %v620_v34  ;;  %v2574_v6 = vld [vmem:[%s4390_s5] sm:$0xff]  ;;  %v2581_v34 = vld [vmem:[%s4390_s5 + $0x38] sm:$0xff]  ;;  %v2583_v37 = vld [vmem:[%s4390_s5 + $0x48] sm:$0xff] }
 0x140   :  { %3422 = vmatpush3.bf16.msra.mxu1 %v3421_v60  ;;  %3135 = vmatprep.mubr.msk.f32.mxu1 %vm3522_vm2, %v3521_v30  ;;  %v2260_v21 = vrot.slane %v640_v13, 2  ;;  %v2414_v25 = vrot.slane %v640_v13, 6  ;;  %v2337_v57 = vrot.slane %v640_v13, 4  ;;  %v3457_v28 = vpack.c.bf16 %v2575_v27, %v2574_v6  ;;  %v2579_v60 = vld [vmem:[%s4390_s5 + $0x28] sm:$0xff] }
 0x141   :  { %3115 = vmatmul.mubr.msk.f32.vlgmr.msra.gmra.mrb[38].mxu0 %vm649_vm3, %v1413_v39  ;;  %3426 = vmatprep.subr.bf16.mxu1 %v3520_v3  ;;  %v641_v26 = vmax.f32 %v634_v58, 0.0  ;;  %v3463_v62 = vpack.c.bf16 %v2579_v60, %v2578_v33  ;;  %v2584_v39 = vld [vmem:[%s4390_s5 + $0x50] sm:$0xff] }
 0x142   :  { %3419 = vmatpush3.bf16.msra.mxu0 %v3418_v38  ;;  %3128 = vmatprep.mubr.msk.f32.mxu0 %vm3522_vm2, %v3521_v30  ;;  %v3469_v38 = vpack.c.bf16 %v2583_v37, %v2582_v36  ;;  %v3472_v41 = vpack.c.bf16 %v2585_v40, %v2584_v39 }
 0x143   :  { %3136 = vmatmul.mubr.msk.f32.vlgmr.msra.gmra.mrb[40].mxu1 %vm649_vm3, %v1644_v43  ;;  %3423 = vmatprep.subr.bf16.mxu0 %v3520_v3  ;;  %v2587_v43 = vld [vmem:[%s4390_s5 + $0x68] sm:$0xff] }
 0x144   :  { %3428 = vmatpush3.bf16.msra.mxu1 %v3427_v42  ;;  %3149 = vmatprep.mubr.msk.f32.mxu1 %vm3522_vm2, %v3521_v30  ;;  %v2586_v42 = vld [vmem:[%s4390_s5 + $0x60] sm:$0xff] }
 0x145   :  { %3129 = vmatmul.mubr.msk.f32.vlgmr.msra.gmra.mrb[40].mxu0 %vm649_vm3, %v638_v63  ;;  %3432 = vmatprep.subr.bf16.mxu1 %v3520_v3  ;;  %v2580_v63 = vld [vmem:[%s4390_s5 + $0x30] sm:$0xff]  ;;  %v3475_v44 = vpack.c.bf16 %v2587_v43, %v2586_v42 }
 0x146   :  { %3425 = vmatpush3.bf16.msra.mxu0 %v3424_v51  ;;  %3142 = vmatprep.mubr.msk.f32.mxu0 %vm3522_vm2, %v3521_v30  ;;  %v3466_v35 = vpack.c.bf16 %v2581_v34, %v2580_v63  ;;  %v2672_v51 = vld [vmem:[%s4392_s7 + $0x8] sm:$0xff] }
 0x147   :  { %3150 = vmatmul.mubr.msk.f32.vlgmr.msra.gmra.mrb[42].mxu1 %vm649_vm3, %v1798_v48  ;;  %3429 = vmatprep.subr.bf16.mxu0 %v3520_v3  ;;  %v3478_v45 = vpack.c.bf16 %v2672_v51, %v2671_v49 }
 0x148   :  { %3434 = vmatpush3.bf16.msra.mxu1 %v3433_v47  ;;  %3163 = vmatprep.mubr.msk.f32.mxu1 %vm3522_vm2, %v3521_v30  ;;  %v2674_v47 = vld [vmem:[%s4392_s7 + $0x18] sm:$0xff] }
 0x149   :  { %3143 = vmatmul.mubr.msk.f32.vlgmr.msra.gmra.mrb[42].mxu0 %vm649_vm3, %v1721_v1  ;;  %3438 = vmatprep.subr.bf16.mxu1 %v3520_v3  ;;  %v3481_v48 = vpack.c.bf16 %v2674_v47, %v2673_v54  ;;  %v2678_v1 = vld [vmem:[%s4392_s7 + $0x38] sm:$0xff] }
 0x14a   :  { %3431 = vmatpush3.bf16.msra.mxu0 %v3430_v0  ;;  %3156 = vmatprep.mubr.msk.f32.mxu0 %vm3522_vm2, %v3521_v30  ;;  %v2677_v0 = vld [vmem:[%s4392_s7 + $0x30] sm:$0xff] }
 0x14b   :  { %3164 = vmatmul.mubr.msk.f32.vlgmr.msra.gmra.mrb[44].mxu1 %vm649_vm3, %v1952_v7  ;;  %3435 = vmatprep.subr.bf16.mxu0 %v3520_v3  ;;  %v3487_v2 = vpack.c.bf16 %v2678_v1, %v2677_v0 }
 0x14c   :  { %3440 = vmatpush3.bf16.msra.mxu1 %v3439_v5  ;;  %3177 = vmatprep.mubr.msk.f32.mxu1 %vm3522_vm2, %v3521_v30 }
 0x14d   :  { %3157 = vmatmul.mubr.msk.f32.vlgmr.msra.gmra.mrb[44].mxu0 %vm649_vm3, %v639_v56  ;;  %3444 = vmatprep.subr.bf16.mxu1 %v3520_v3  ;;  %v2675_v56 = vld [vmem:[%s4392_s7 + $0x20] sm:$0xff] }
 0x14e   :  { %3437 = vmatpush3.bf16.msra.mxu0 %v3436_v52  ;;  %3170 = vmatprep.mubr.msk.f32.mxu0 %vm3522_vm2, %v3521_v30  ;;  %v3484_v61 = vpack.c.bf16 %v2676_v59, %v2675_v56 }
 0x14f   :  { %3178 = vmatmul.mubr.msk.f32.vlgmr.msra.gmra.mrb[46].mxu1 %vm649_vm3, %v2106_v12  ;;  %3441 = vmatprep.subr.bf16.mxu0 %v3520_v3 }
 0x150   :  { %3446 = vmatpush3.bf16.msra.mxu1 %v3445_v11  ;;  %3191 = vmatprep.mubr.msk.f32.mxu1 %vm3522_vm2, %v3521_v30 }
 0x151   :  { %3171 = vmatmul.mubr.msk.f32.vlgmr.msra.gmra.mrb[46].mxu0 %vm649_vm3, %v2029_v17  ;;  %3450 = vmatprep.subr.bf16.mxu1 %v3520_v3 }
 0x152   :  { %3443 = vmatpush3.bf16.msra.mxu0 %v3442_v16  ;;  %3184 = vmatprep.mubr.msk.f32.mxu0 %vm3522_vm2, %v3521_v30 }
 0x153   :  { %3192 = vmatmul.mubr.msk.f32.vlgmr.msra.gmra.mrb[48].mxu1 %vm649_vm3, %v2260_v21  ;;  %3447 = vmatprep.subr.bf16.mxu0 %v3520_v3 }
 0x154   :  { %3452 = vmatpush3.bf16.msra.mxu1 %v3451_v20  ;;  %3205 = vmatprep.mubr.msk.f32.mxu1 %vm3522_vm2, %v3521_v30 }
 0x155   :  { %3185 = vmatmul.mubr.msk.f32.vlgmr.msra.gmra.mrb[48].mxu0 %vm649_vm3, %v640_v13  ;;  %3456 = vmatprep.subr.bf16.mxu1 %v3520_v3 }
 0x156   :  { %3449 = vmatpush3.bf16.msra.mxu0 %v3448_v22  ;;  %3198 = vmatprep.mubr.msk.f32.mxu0 %vm3522_vm2, %v3521_v30 }
 0x157   :  { %3206 = vmatmul.mubr.msk.f32.vlgmr.msra.gmra.mrb[50].mxu1 %vm649_vm3, %v2414_v25  ;;  %3453 = vmatprep.subr.bf16.mxu0 %v3520_v3 }
 0x158   :  { %3245 = vmatprep.mubr.msk.f32.mxu1 %vm3522_vm2, %v3521_v30  ;;  %3458 = vmatpush3.bf16.msra.mxu1 %v3457_v28 }
 0x159   :  { %3199 = vmatmul.mubr.msk.f32.vlgmr.msra.gmra.mrb[50].mxu0 %vm649_vm3, %v2337_v57  ;;  %3459 = vmatprep.subr.bf16.mxu1 %v3520_v3 }
 0x15a   :  { %3455 = vmatpush3.bf16.msra.mxu0 %v3454_v55  ;;  %3212 = vmatprep.mubr.msk.f32.mxu0 %vm3522_vm2, %v3521_v30 }
 0x15b   :  { %3477 = vmatprep.subr.bf16.mxu0 %v3520_v3 }
 0x15c   :  { %3461 = vmatpush3.bf16.msra.mxu1 %v3460_v32 }
 0x15d   :  { %3213 = vmatmul.mubr.msk.f32.vlgmr.msra.gmra.mrb[52].mxu0 %vm649_vm3, %v641_v26  ;;  %3462 = vmatprep.subr.bf16.mxu1 %v3520_v3 }
 0x15e   :  { %3270 = vmatprep.mubr.msk.f32.mxu0 %vm3522_vm2, %v3521_v30  ;;  %3479 = vmatpush3.bf16.msra.mxu0 %v3478_v45 }
 0x15f   :  { %3480 = vmatprep.subr.bf16.mxu0 %v3520_v3 }
 0x160   :  { %3464 = vmatpush3.bf16.msra.mxu1 %v3463_v62 }
 0x161   :  { %3465 = vmatprep.subr.bf16.mxu1 %v3520_v3 }
 0x162   :  { %3482 = vmatpush3.bf16.msra.mxu0 %v3481_v48 }
 0x163   :  { %3483 = vmatprep.subr.bf16.mxu0 %v3520_v3 }
 0x164   :  { %3467 = vmatpush3.bf16.msra.mxu1 %v3466_v35 }
 0x165   :  { %3468 = vmatprep.subr.bf16.mxu1 %v3520_v3 }
 0x166   :  { %3485 = vmatpush3.bf16.msra.mxu0 %v3484_v61 }
 0x167   :  { %3486 = vmatprep.subr.bf16.mxu0 %v3520_v3 }
 0x168   :  { %3470 = vmatpush3.bf16.msra.mxu1 %v3469_v38 }
 0x169   :  { %3471 = vmatprep.subr.bf16.mxu1 %v3520_v3 }
 0x16a   :  { %3488 = vmatpush3.bf16.msra.mxu0 %v3487_v2 }
 0x16b   :  { %3489 = vmatprep.subr.bf16.mxu0 %v3520_v3 }
 0x16c   :  { %3473 = vmatpush3.bf16.msra.mxu1 %v3472_v41 }
 0x16d   :  { %3474 = vmatprep.subr.bf16.mxu1 %v3520_v3 }
 0x170   :  { %3476 = vmatpush3.bf16.msra.mxu1 %v3475_v44 }
 0x171   :  { %3243 = vmatprep.subr.mxu1 %v3521_v30 }
 0x174   :  { %3244 = vmatpush3.msra.mxu1 %v2588_v46 }
 0x1fe   :  { %v790_v4 = vpop.f32.mrb[28].mxu1 }
 0x1ff   :  { %v3053_v5 = vpop.f32.mrb[29].mxu1 }
 0x200   :  { %v718_v7 = vpop.f32.mrb[28].mxu0 }
 0x201   :  { %v791_v8 = vadd.f32 %v790_v4, %v718_v7  ;;  %v3046_v9 = vpop.f32.mrb[29].mxu0 }
 0x202   :  { %v943_v50 = vpop.f32.mrb[30].mxu1 }
 0x203   :  { %v3067_v52 = vpop.f32.mrb[31].mxu1 }
 0x204   :  { %v866_v53 = vpop.f32.mrb[30].mxu0 }
 0x205   :  { %v870_v10 = vadd.f32 %v866_v53, %v791_v8  ;;  %v3060_v11 = vpop.f32.mrb[31].mxu0 }
 0x206   :  { %v1097_v12 = vpop.f32.mrb[32].mxu1  ;;  %v2931_v11 = vld [vmem:[%s4389_s4] ss:$0 sm:$0xff] }
 0x207   :  { %v3081_v13 = vpop.f32.mrb[33].mxu1  ;;  %v947_v14 = vadd.f32 %v943_v50, %v870_v10 }
 0x208   :  { %v1020_v15 = vpop.f32.mrb[32].mxu0 }
 0x209   :  { %v1024_v16 = vadd.f32 %v1020_v15, %v947_v14  ;;  %v3074_v17 = vpop.f32.mrb[33].mxu0 }
 0x20a   :  { %v1251_v18 = vpop.f32.mrb[34].mxu1  ;;  %v2680_v17 = vld [vmem:[%s4392_s7 + $0x48] sm:$0xff] }
 0x20b   :  { %v3095_v19 = vpop.f32.mrb[35].mxu1  ;;  %v1101_v20 = vadd.f32 %v1097_v12, %v1024_v16  ;;  %v2679_v16 = vld [vmem:[%s4392_s7 + $0x40] sm:$0xff] }
 0x20c   :  { %v1174_v3 = vpop.f32.mrb[34].mxu0  ;;  %v2681_v19 = vld [vmem:[%s4392_s7 + $0x50] sm:$0xf]  ;;  %s3496_s7 = scalar_lea.vmem %s2776_s17, 32 }
 0x20d   :  { %v1178_v21 = vadd.f32 %v1174_v3, %v1101_v20  ;;  %v3088_v22 = vpop.f32.mrb[35].mxu0  ;;  %v2932_v20 = vld [vmem:[%s4391_s6] ss:$0 sm:$0xff]  ;;  %p3497_p0 = scmp.ne.s32.totalorder %s2776_s17, %s3496_s7  ;;  %p3502_p2 = scmp.lt.s32.totalorder %s3496_s7, %s3496_s7 }
 0x20e   :  { %v1405_v23 = vpop.f32.mrb[36].mxu1 }
 0x20f   :  { %v3109_v24 = vpop.f32.mrb[37].mxu1  ;;  %v1255_v25 = vadd.f32 %v1251_v18, %v1178_v21  ;;  %v3490_v18 = vpack.c.bf16 %v2680_v17, %v2679_v16  ;;  %p3503_p3 = por %p3502_p2, %p3501_p1 }
 0x210   :  { %v1328_v55 = vpop.f32.mrb[36].mxu0 }
 0x211   :  { %v1332_v57 = vadd.f32 %v1328_v55, %v1255_v25  ;;  %v3102_v58 = vpop.f32.mrb[37].mxu0  ;;  %3491 = vmatpush3.bf16.msra.mxu0 %v3490_v18  ;;  %p3504_p4 = pnand %p3503_p3, %p3497_p0 }
 0x212   :  { %v1559_v26 = vpop.f32.mrb[38].mxu1  ;;  %3268 = vmatprep.subr.mxu0 %v3521_v30  ;;  %v2934_v30 = vld [vmem:[%s4393_s8] ss:$0 sm:$0xff] }
 0x213   :  { %v3123_v6 = vpop.f32.mrb[39].mxu1  ;;  %v1409_v27 = vadd.f32 %v1405_v23, %v1332_v57 }
 0x214   :  { %v1482_v28 = vpop.f32.mrb[38].mxu0 }
 0x215   :  { %v1486_v29 = vadd.f32 %v1482_v28, %v1409_v27  ;;  %v3116_v31 = vpop.f32.mrb[39].mxu0  ;;  %3269 = vmatpush3.msk.msra.mxu0 %vm2693_vm5, %v2681_v19 }
 0x216   :  { %v1713_v32 = vpop.f32.mrb[40].mxu1 }
 0x217   :  { %v3137_v33 = vpop.f32.mrb[41].mxu1  ;;  %v1563_v60 = vadd.f32 %v1559_v26, %v1486_v29 }
 0x218   :  { %v1636_v62 = vpop.f32.mrb[40].mxu0 }
 0x219   :  { %v1640_v63 = vadd.f32 %v1636_v62, %v1563_v60  ;;  %v3130_v34 = vpop.f32.mrb[41].mxu0 }
 0x21a   :  { %v1867_v35 = vpop.f32.mrb[42].mxu1 }
 0x21b   :  { %v3151_v36 = vpop.f32.mrb[43].mxu1  ;;  %v1717_v37 = vadd.f32 %v1713_v32, %v1640_v63 }
 0x21c   :  { %v1790_v38 = vpop.f32.mrb[42].mxu0 }
 0x21d   :  { %v1794_v39 = vadd.f32 %v1790_v38, %v1717_v37  ;;  %v3144_v40 = vpop.f32.mrb[43].mxu0 }
 0x21e   :  { %v2021_v41 = vpop.f32.mrb[44].mxu1 }
 0x21f   :  { %v3165_v42 = vpop.f32.mrb[45].mxu1  ;;  %v1871_v43 = vadd.f32 %v1867_v35, %v1794_v39 }
 0x220   :  { %v1944_v44 = vpop.f32.mrb[44].mxu0 }
 0x221   :  { %v1948_v46 = vadd.f32 %v1944_v44, %v1871_v43  ;;  %v3158_v49 = vpop.f32.mrb[45].mxu0 }
 0x222   :  { %v2175_v51 = vpop.f32.mrb[46].mxu1 }
 0x223   :  { %v3179_v54 = vpop.f32.mrb[47].mxu1  ;;  %v2025_v45 = vadd.f32 %v2021_v41, %v1948_v46 }
 0x224   :  { %v2098_v47 = vpop.f32.mrb[46].mxu0 }
 0x225   :  { %v2102_v48 = vadd.f32 %v2098_v47, %v2025_v45  ;;  %v3172_v56 = vpop.f32.mrb[47].mxu0 }
 0x226   :  { %v2329_v59 = vpop.f32.mrb[48].mxu1 }
 0x227   :  { %v3193_v61 = vpop.f32.mrb[49].mxu1  ;;  %v2179_v0 = vadd.f32 %v2175_v51, %v2102_v48 }
 0x228   :  { %v2252_v1 = vpop.f32.mrb[48].mxu0 }
 0x229   :  { %v2256_v2 = vadd.f32 %v2252_v1, %v2179_v0  ;;  %v3186_v4 = vpop.f32.mrb[49].mxu0 }
 0x22a   :  { %v2483_v5 = vpop.f32.mrb[50].mxu1 }
 0x22b   :  { %v3207_v7 = vpop.f32.mrb[51].mxu1  ;;  %v2333_v8 = vadd.f32 %v2329_v59, %v2256_v2 }
 0x22c   :  { %v2406_v9 = vpop.f32.mrb[50].mxu0 }
 0x22d   :  { %v2410_v50 = vadd.f32 %v2406_v9, %v2333_v8  ;;  %v3200_v52 = vpop.f32.mrb[51].mxu0 }
 0x22f   :  { %v2487_v53 = vadd.f32 %v2483_v5, %v2410_v50 }
 0x230   :  { %v2560_v10 = vpop.f32.mrb[52].mxu0 }
 0x231   :  { %v2564_v12 = vadd.f32 %v2560_v10, %v2487_v53  ;;  %v3214_v13 = vpop.f32.mrb[53].mxu0 }
 0x233   :  { %v2572_v14 = vadd.f32 %v2931_v11, %v2564_v12 }
 0x235   :  { %v2573_v15 = vmax.f32 %v2572_v14, 0.0 }
 0x237   :  { %3246 = vmatmul.mubr.msk.f32.vlgmr.msra.gmra.mrb[52].mxu1 %vm2596_vm4, %v2573_v15 }
 0x30a   :  { %v2666_v3 = vpop.f32.mrb[52].mxu1 }
 0x30b   :  { %v2667_v21 = vadd.f32 %v2932_v20, %v2666_v3  ;;  %v3247_v22 = vpop.f32.mrb[53].mxu1 }
 0x30d   :  { %v2670_v23 = vmax.f32 %v2667_v21, 0.0 }
 0x30f   :  { %3271 = vmatmul.mubr.msk.f32.vlgmr.msra.gmra.mrb[54].mxu0 %vm2689_vm6, %v2670_v23 }
 0x3e2   :  { %v2763_v24 = vpop.f32.mrb[54].mxu0 }
 0x3e3   :  { %v2764_v25 = vadd.f32 %v2934_v30, %v2763_v24  ;;  %v3272_v55 = vpop.f32.mrb[55].mxu0 }
 0x3e5   :  { %2768 = vst.msk [vmem:[#allocation2] sm:$0x3] %vm2767_vm7, %v2764_v25 }
 0x3e6   :  { %3507 = shalt.err (!%p3504_p4)
}
 0x3e7   :  { %s3508_s19 = scalar_lea.hbm %s4394_s9, 32 }
 0x3e8   :  { %p3509_p5 = scmp.ne.s32.totalorder %s4394_s9, %s3508_s19  ;;  %p3512_p6 = scmp.lt.u32.totalorder %s3508_s19, %s4394_s9 }
 0x3ea   :  { %p3514_p7 = pnand %p3512_p6, %p3509_p5 }
 0x3ec   :  { %3517 = shalt.err (!%p3514_p7)
}
 0x3ed   :  { %2778 = dma.vmem_to_hbm [thread:$0]  %s2776_s17, 32, %s4394_s9, [#allocation3]  }
 0x3ee   :  { %3518 = dma.done.wait [#allocation3], 32  }
 0x3ef   :  { %3519 = vsyncadd [#allocation3], 4294967264 }
 0x3f0   :  { %2782 = vsyncpa [#allocation3], 1 }

</bundles_post_ra>
